<compile_context>
chip_gen: v6e
topology: v6e:2x2x1
jax: 0.10.0
libtpu: 0.0.40
codegen_flags: <defaults>
</compile_context>

<pallas_src>
import functools

import jax
import jax.numpy as jnp
from jax.experimental import pallas as pl
from jax.experimental.pallas import tpu as pltpu


# ----------------------------------------------------------------------------
# Fused Pallas kernel: one grid step == one batch sample, all in VMEM.
# ----------------------------------------------------------------------------
def _cloak_fused_kernel(imgs_ref, wt_ref, bc_ref, wl_ref, mask_ref, out_ref,
                        *, wp, n_out, inv_hw):
    """Grid = (batch sample b,).

    imgs_ref : (1, 3, C, L) f32  zero-padded images [x+dx, y, x]; L = (H+2)*(W+2)
                                 flattened padded pixels live in the lane dim.
    wt_ref   : (9, 2F, C)   f32  per-tap conv weights; rows [0:F) = feature
                                 extractor, rows [F:2F) = vgg stage.
    bc_ref   : (2F, 1)      f32  concatenated biases.
    wl_ref   : (F, 1)       f32  non-negative LPIPS 1x1-conv weights.
    mask_ref : (1, N)       f32  1.0 at real output pixels, 0.0 at the row-wrap
                                 junk columns of the padded flat layout.
    out_ref  : (1, 8, 128)  f32  lane-dense result slab; row 0 = squared-L2
                                 partial, rows 1.. = LPIPS distance.
    """
    two_f = wt_ref.shape[1]
    f = two_f // 2

    b_cat = bc_ref[...]                      # (2F, 1)
    w_lin = wl_ref[...]                      # (F, 1)
    mask = mask_ref[...]                     # (1, N)
    offsets = [dh * wp + dw for dh in range(3) for dw in range(3)]

    def conv_relu(s):
        """3x3 SAME conv + ReLU of image s via 9 accumulating shifted matmuls.

        Output is (2F, N) with pixels in lanes; anchor position i of the
        flattened padded image needs taps at i + dh*Wp + dw, so each tap is a
        static lane-shifted slice of the (C, L) image followed by a small
        (2F, C) x (C, N) MXU matmul.
        """
        img = imgs_ref[0, s]                 # (C, L) f32
        acc = jnp.zeros((two_f, n_out), jnp.float32)
        for t, off in enumerate(offsets):
            acc = acc + jnp.dot(wt_ref[t], img[:, off:off + n_out],
                                preferred_element_type=jnp.float32)
        return jnp.maximum(acc + b_cat, 0.0)

    feat_xd = conv_relu(0)                   # x + dx: both branches at once
    feat_y = conv_relu(1)                    # y  (feature-extractor rows used)
    feat_x = conv_relu(2)                    # x  (vgg rows used)

    # --- feature-extractor branch: || phi(x+dx) - phi(y) ||_2^2 (masked) ----
    d = feat_xd[:f] - feat_y[:f]             # (F, N)
    l2 = jnp.sum(d * d * mask)

    # --- LPIPS branch: channel-unit-normalize, weighted sq. diff, pixel mean -
    v1 = feat_xd[f:]                         # vgg(x+dx)  (F, N)
    v2 = feat_x[f:]                          # vgg(x)
    eps = 1e-10
    # Same 1/(sqrt(s)+eps) form as the reference; reciprocal runs on the EUP.
    inv1 = pl.reciprocal(
        jnp.sqrt(jnp.sum(v1 * v1, axis=0, keepdims=True)) + eps, approx=True)
    inv2 = pl.reciprocal(
        jnp.sqrt(jnp.sum(v2 * v2, axis=0, keepdims=True)) + eps, approx=True)
    nd = v1 * inv1 - v2 * inv2               # (F, N)
    lp = jnp.sum(jnp.sum(w_lin * nd * nd, axis=0, keepdims=True) * mask) * inv_hw

    # Lane-dense (8, 128) output vreg: row 0 carries l2, other rows carry lpips.
    row = jax.lax.broadcasted_iota(jnp.int32, out_ref.shape[1:], 0)
    out_ref[0] = jnp.where(row == 0, l2, lp)


# ----------------------------------------------------------------------------
# Synthetic parameters (deterministic, no checkpoints)
# ----------------------------------------------------------------------------
def make_params(c_in=4, f_feat=8, f_vgg=8):
    """Deterministic synthetic weights (fixed keys, scaled normals)."""
    k = jax.random.PRNGKey(1234)
    k1, k2, k3, k4, k5 = jax.random.split(k, 5)
    kdim = 9 * c_in
    return {
        # feature_extractor: Conv2d(c_in, f_feat, 3, padding=1) + ReLU
        "w_feat": jax.random.normal(k1, (kdim, f_feat), jnp.float32) * 0.1,
        "b_feat": jax.random.normal(k2, (f_feat,), jnp.float32) * 0.01,
        # LPIPS "vgg" stage: Conv2d(c_in, f_vgg, 3, padding=1) + ReLU
        "w_vgg": jax.random.normal(k3, (kdim, f_vgg), jnp.float32) * 0.1,
        "b_vgg": jax.random.normal(k4, (f_vgg,), jnp.float32) * 0.01,
        # LPIPS linear (1x1 conv) weights are non-negative
        "w_lin": jnp.abs(jax.random.normal(k5, (f_vgg,), jnp.float32)) * 0.5,
    }


# ----------------------------------------------------------------------------
# Wrapper
# ----------------------------------------------------------------------------
@functools.partial(jax.jit, static_argnames=("alpha", "p"))
def cloak_loss(x, y, delta_x, params, alpha=0.5, p=0.05):
    """x, y, delta_x: (B, C, H, W) float32 (NCHW, like the PyTorch module)."""
    B, C, H, W = x.shape
    Hp, Wp = H + 2, W + 2
    L = Hp * Wp
    HW = H * W
    # Contiguous range of conv anchor positions in the flattened padded image
    # that covers every real output pixel (plus 2 masked junk columns per row).
    N = H * Wp - 2

    f_feat = params["w_feat"].shape[1]
    f_vgg = params["w_vgg"].shape[1]
    assert f_feat == f_vgg, "concatenated-weight path assumes equal widths"
    F = f_feat
    K = params["w_feat"].shape[0]
    assert K == 9 * C

    # --- one stacked, zero-padded, f32 image tensor (single DMA stream) -----
    # Raw pixels only (no im2col blowup, no HBM-materialized patch arrays);
    # f32 is kept on purpose: x and x+dx differ by ~delta and the LPIPS branch
    # is sensitive to rounding them independently to bf16.
    x_adv = x + delta_x
    imgs = jnp.stack([x_adv, y, x], axis=1)                           # (B,3,C,H,W)
    imgs = jnp.pad(imgs, ((0, 0), (0, 0), (0, 0), (1, 1), (1, 1)))    # SAME pad
    imgs = imgs.reshape(B, 3, C, L).astype(jnp.float32)

    # --- per-tap weights, feature-extractor | vgg stages concatenated -------
    wf = params["w_feat"].reshape(9, C, F).transpose(0, 2, 1)         # (9,F,C)
    wv = params["w_vgg"].reshape(9, C, F).transpose(0, 2, 1)
    w_taps = jnp.concatenate([wf, wv], axis=1).astype(jnp.float32)    # (9,2F,C)
    b_cat = jnp.concatenate([params["b_feat"], params["b_vgg"]]
                            ).reshape(2 * F, 1).astype(jnp.float32)
    w_lin = params["w_lin"].reshape(F, 1).astype(jnp.float32)

    # Valid-pixel mask over the N anchor positions (junk = row-wrap columns).
    col = jnp.arange(N, dtype=jnp.int32) % Wp
    mask = (col < W).astype(jnp.float32).reshape(1, N)

    kernel = functools.partial(_cloak_fused_kernel, wp=Wp, n_out=N,
                               inv_hw=1.0 / HW)

    # Advisory cost estimate: 9 taps x 3 images of (2F,C)x(C,N) matmuls.
    flops = 2 * B * N * K * 2 * F * 3 + 60 * B * N * F
    bytes_accessed = (B * 3 * C * L * 4
                      + (9 * 2 * F * C + 3 * F + N) * 4
                      + B * 8 * 128 * 4)

    out = pl.pallas_call(
        kernel,
        out_shape=jax.ShapeDtypeStruct((B, 8, 128), jnp.float32),
        grid_spec=pltpu.PrefetchScalarGridSpec(
            num_scalar_prefetch=0,
            grid=(B,),                     # whole sample per step: no inner
                                           # reduction loop, no scratch acc
            in_specs=[
                pl.BlockSpec((1, 3, C, L), lambda b: (b, 0, 0, 0)),
                pl.BlockSpec((9, 2 * F, C), lambda b: (0, 0, 0)),
                pl.BlockSpec((2 * F, 1), lambda b: (0, 0)),
                pl.BlockSpec((F, 1), lambda b: (0, 0)),
                pl.BlockSpec((1, N), lambda b: (0, 0)),
            ],
            out_specs=pl.BlockSpec((1, 8, 128), lambda b: (b, 0, 0)),
        ),
        compiler_params=pltpu.CompilerParams(
            # Per-sample independent work -> batch axis shards across both
            # TensorCores on v7x when B >= 2.
            # TODO(synk): for B == 1 on v7x, add a second parallel axis that
            #             splits the image into halo'd row chunks with
            #             per-chunk partial outputs summed in the wrapper.
            dimension_semantics=("parallel",),
            vmem_limit_bytes=32 * 1024 * 1024,
        ),
        cost_estimate=pl.CostEstimate(flops=flops, transcendentals=2 * B * N,
                                      bytes_accessed=bytes_accessed),
    )(imgs, w_taps, b_cat, w_lin, mask)

    # Combine per-sample partials in the wrapper.
    l2_loss = jnp.sum(out[:, 0, 0])            # torch.norm(...)**2 over batch
    lpips_loss = out[:, 1, 0]                  # per-sample perceptual distance
    penalty = jnp.maximum(lpips_loss - p, 0.0)
    total = l2_loss + alpha * penalty
    # LPIPS returns (B,1,1,1) in torch, so total_loss broadcasts to that shape.
    return total.reshape(B, 1, 1, 1)


# ----------------------------------------------------------------------------
# Pure-JAX reference (f32) for a correctness sanity check
# ----------------------------------------------------------------------------
def _im2col_3x3(x_nhwc):
    """(B, H, W, C) -> (B, H*W, 9*C), SAME padding, tap-major / channel-minor."""
    B, H, W, C = x_nhwc.shape
    xp = jnp.pad(x_nhwc, ((0, 0), (1, 1), (1, 1), (0, 0)))
    taps = [xp[:, dh:dh + H, dw:dw + W, :] for dh in range(3) for dw in range(3)]
    return jnp.concatenate(taps, axis=-1).reshape(B, H * W, 9 * C)


def cloak_loss_reference(x, y, delta_x, params, alpha=0.5, p=0.05):
    B, C, H, W = x.shape

    def feats(img, w, b):
        pt = _im2col_3x3(jnp.transpose(img, (0, 2, 3, 1)))          # (B, HW, K)
        return jnp.maximum(
            jnp.einsum("bmk,kf->bmf", pt, w,
                       precision=jax.lax.Precision.HIGHEST) + b, 0.0)

    x_adv = x + delta_x
    phi_xd = feats(x_adv, params["w_feat"], params["b_feat"])
    phi_y = feats(y, params["w_feat"], params["b_feat"])
    l2 = jnp.sum((phi_xd - phi_y) ** 2)

    v1 = feats(x_adv, params["w_vgg"], params["b_vgg"])
    v2 = feats(x, params["w_vgg"], params["b_vgg"])
    eps = 1e-10
    n1 = v1 / (jnp.sqrt(jnp.sum(v1 * v1, -1, keepdims=True)) + eps)
    n2 = v2 / (jnp.sqrt(jnp.sum(v2 * v2, -1, keepdims=True)) + eps)
    lpips = jnp.mean(jnp.sum(((n1 - n2) ** 2) * params["w_lin"], -1), -1)
    total = l2 + alpha * jnp.maximum(lpips - p, 0.0)
    return total.reshape(B, 1, 1, 1)


if __name__ == "__main__":
    B, C, H, W = 2, 4, 16, 16
    key = jax.random.PRNGKey(0)
    kx, ky, kd = jax.random.split(key, 3)
    x = jax.random.normal(kx, (B, C, H, W), jnp.float32)
    y = jax.random.normal(ky, (B, C, H, W), jnp.float32)
    delta_x = 0.05 * jax.random.normal(kd, (B, C, H, W), jnp.float32)

    params = make_params(c_in=C, f_feat=8, f_vgg=8)

    out = cloak_loss(x, y, delta_x, params, alpha=0.5, p=0.05)
    out = jax.block_until_ready(out)

    assert out.shape == (B, 1, 1, 1) and out.dtype == jnp.float32
    assert bool(jnp.all(jnp.isfinite(out)))

    ref = cloak_loss_reference(x, y, delta_x, params, alpha=0.5, p=0.05)
    assert bool(jnp.allclose(out, ref, rtol=2e-2, atol=1e-2)), (out, ref)

    print("KERNEL_OK")
</pallas_src>

<mosaic_0001>
module attributes {stable_mosaic.version = 11 : i64} {
  func.func @_cloak_fused_kernel(%arg0: i32, %arg1: memref<1x3x4x324xf32, #tpu.memory_space<vmem>>, %arg2: memref<9x16x4xf32, #tpu.memory_space<vmem>>, %arg3: memref<16x1xf32, #tpu.memory_space<vmem>>, %arg4: memref<8x1xf32, #tpu.memory_space<vmem>>, %arg5: memref<1x286xf32, #tpu.memory_space<vmem>>, %arg6: memref<1x8x128xf32, #tpu.memory_space<vmem>>) attributes {dimension_semantics = [#tpu.dimension_semantics<parallel>], iteration_bounds = array<i64: 2>, scalar_prefetch = 0 : i64, scratch_operands = 0 : i64, tpu.core_type = #tpu.core_type<tc>, window_params = [{transform_indices = @transform_0, window_bounds = array<i64: 1, 3, 4, 324>}, {pipeline_mode = #tpu.pipeline_mode<synchronous>, transform_indices = @transform_1, window_bounds = array<i64: 9, 16, 4>}, {pipeline_mode = #tpu.pipeline_mode<synchronous>, transform_indices = @transform_2, window_bounds = array<i64: 16, 1>}, {pipeline_mode = #tpu.pipeline_mode<synchronous>, transform_indices = @transform_3, window_bounds = array<i64: 8, 1>}, {pipeline_mode = #tpu.pipeline_mode<synchronous>, transform_indices = @transform_4, window_bounds = array<i64: 1, 286>}, {transform_indices = @transform_5, window_bounds = array<i64: 1, 8, 128>}]} {
    %c0 = arith.constant 0 : index
    %c0_0 = arith.constant 0 : index
    %0 = vector.load %arg3[%c0, %c0_0] : memref<16x1xf32, #tpu.memory_space<vmem>>, vector<16x1xf32>
    %c0_1 = arith.constant 0 : index
    %c0_2 = arith.constant 0 : index
    %1 = vector.load %arg4[%c0_1, %c0_2] : memref<8x1xf32, #tpu.memory_space<vmem>>, vector<8x1xf32>
    %c0_3 = arith.constant 0 : index
    %c0_4 = arith.constant 0 : index
    %2 = vector.load %arg5[%c0_3, %c0_4] : memref<1x286xf32, #tpu.memory_space<vmem>>, vector<1x286xf32>
    %c0_5 = arith.constant 0 : index
    %c0_6 = arith.constant 0 : index
    %c0_7 = arith.constant 0 : index
    %c0_8 = arith.constant 0 : index
    %3 = vector.load %arg1[%c0_5, %c0_6, %c0_7, %c0_8] : memref<1x3x4x324xf32, #tpu.memory_space<vmem>>, vector<1x1x4x324xf32>
    %4 = vector.shape_cast %3 : vector<1x1x4x324xf32> to vector<4x324xf32>
    %cst = arith.constant 0.000000e+00 : f32
    %5 = vector.broadcast %cst : f32 to vector<16x286xf32>
    %c0_9 = arith.constant 0 : index
    %c0_10 = arith.constant 0 : index
    %c0_11 = arith.constant 0 : index
    %6 = vector.load %arg2[%c0_9, %c0_10, %c0_11] : memref<9x16x4xf32, #tpu.memory_space<vmem>>, vector<1x16x4xf32>
    %7 = vector.shape_cast %6 : vector<1x16x4xf32> to vector<16x4xf32>
    %8 = vector.extract_strided_slice %4 {offsets = [0, 0], sizes = [4, 286], strides = [1, 1]} : vector<4x324xf32> to vector<4x286xf32>
    %cst_12 = arith.constant dense<0.000000e+00> : vector<16x286xf32>
    %9 = tpu.matmul %7, %8, %cst_12 {dimension_numbers = #tpu.dot_dimension_numbers<[1], [0], [0], [1], [0, 0, 1, 1], [], []>} : vector<16x4xf32>, vector<4x286xf32>, vector<16x286xf32> -> vector<16x286xf32>
    %10 = arith.addf %5, %9 : vector<16x286xf32>
    %c1 = arith.constant 1 : index
    %c0_13 = arith.constant 0 : index
    %c0_14 = arith.constant 0 : index
    %11 = vector.load %arg2[%c1, %c0_13, %c0_14] : memref<9x16x4xf32, #tpu.memory_space<vmem>>, vector<1x16x4xf32>
    %12 = vector.shape_cast %11 : vector<1x16x4xf32> to vector<16x4xf32>
    %13 = vector.extract_strided_slice %4 {offsets = [0, 1], sizes = [4, 286], strides = [1, 1]} : vector<4x324xf32> to vector<4x286xf32>
    %cst_15 = arith.constant dense<0.000000e+00> : vector<16x286xf32>
    %14 = tpu.matmul %12, %13, %cst_15 {dimension_numbers = #tpu.dot_dimension_numbers<[1], [0], [0], [1], [0, 0, 1, 1], [], []>} : vector<16x4xf32>, vector<4x286xf32>, vector<16x286xf32> -> vector<16x286xf32>
    %15 = arith.addf %10, %14 : vector<16x286xf32>
    %c2 = arith.constant 2 : index
    %c0_16 = arith.constant 0 : index
    %c0_17 = arith.constant 0 : index
    %16 = vector.load %arg2[%c2, %c0_16, %c0_17] : memref<9x16x4xf32, #tpu.memory_space<vmem>>, vector<1x16x4xf32>
    %17 = vector.shape_cast %16 : vector<1x16x4xf32> to vector<16x4xf32>
    %18 = vector.extract_strided_slice %4 {offsets = [0, 2], sizes = [4, 286], strides = [1, 1]} : vector<4x324xf32> to vector<4x286xf32>
    %cst_18 = arith.constant dense<0.000000e+00> : vector<16x286xf32>
    %19 = tpu.matmul %17, %18, %cst_18 {dimension_numbers = #tpu.dot_dimension_numbers<[1], [0], [0], [1], [0, 0, 1, 1], [], []>} : vector<16x4xf32>, vector<4x286xf32>, vector<16x286xf32> -> vector<16x286xf32>
    %20 = arith.addf %15, %19 : vector<16x286xf32>
    %c3 = arith.constant 3 : index
    %c0_19 = arith.constant 0 : index
    %c0_20 = arith.constant 0 : index
    %21 = vector.load %arg2[%c3, %c0_19, %c0_20] : memref<9x16x4xf32, #tpu.memory_space<vmem>>, vector<1x16x4xf32>
    %22 = vector.shape_cast %21 : vector<1x16x4xf32> to vector<16x4xf32>
    %23 = vector.extract_strided_slice %4 {offsets = [0, 18], sizes = [4, 286], strides = [1, 1]} : vector<4x324xf32> to vector<4x286xf32>
    %cst_21 = arith.constant dense<0.000000e+00> : vector<16x286xf32>
    %24 = tpu.matmul %22, %23, %cst_21 {dimension_numbers = #tpu.dot_dimension_numbers<[1], [0], [0], [1], [0, 0, 1, 1], [], []>} : vector<16x4xf32>, vector<4x286xf32>, vector<16x286xf32> -> vector<16x286xf32>
    %25 = arith.addf %20, %24 : vector<16x286xf32>
    %c4 = arith.constant 4 : index
    %c0_22 = arith.constant 0 : index
    %c0_23 = arith.constant 0 : index
    %26 = vector.load %arg2[%c4, %c0_22, %c0_23] : memref<9x16x4xf32, #tpu.memory_space<vmem>>, vector<1x16x4xf32>
    %27 = vector.shape_cast %26 : vector<1x16x4xf32> to vector<16x4xf32>
    %28 = vector.extract_strided_slice %4 {offsets = [0, 19], sizes = [4, 286], strides = [1, 1]} : vector<4x324xf32> to vector<4x286xf32>
    %cst_24 = arith.constant dense<0.000000e+00> : vector<16x286xf32>
    %29 = tpu.matmul %27, %28, %cst_24 {dimension_numbers = #tpu.dot_dimension_numbers<[1], [0], [0], [1], [0, 0, 1, 1], [], []>} : vector<16x4xf32>, vector<4x286xf32>, vector<16x286xf32> -> vector<16x286xf32>
    %30 = arith.addf %25, %29 : vector<16x286xf32>
    %c5 = arith.constant 5 : index
    %c0_25 = arith.constant 0 : index
    %c0_26 = arith.constant 0 : index
    %31 = vector.load %arg2[%c5, %c0_25, %c0_26] : memref<9x16x4xf32, #tpu.memory_space<vmem>>, vector<1x16x4xf32>
    %32 = vector.shape_cast %31 : vector<1x16x4xf32> to vector<16x4xf32>
    %33 = vector.extract_strided_slice %4 {offsets = [0, 20], sizes = [4, 286], strides = [1, 1]} : vector<4x324xf32> to vector<4x286xf32>
    %cst_27 = arith.constant dense<0.000000e+00> : vector<16x286xf32>
    %34 = tpu.matmul %32, %33, %cst_27 {dimension_numbers = #tpu.dot_dimension_numbers<[1], [0], [0], [1], [0, 0, 1, 1], [], []>} : vector<16x4xf32>, vector<4x286xf32>, vector<16x286xf32> -> vector<16x286xf32>
    %35 = arith.addf %30, %34 : vector<16x286xf32>
    %c6 = arith.constant 6 : index
    %c0_28 = arith.constant 0 : index
    %c0_29 = arith.constant 0 : index
    %36 = vector.load %arg2[%c6, %c0_28, %c0_29] : memref<9x16x4xf32, #tpu.memory_space<vmem>>, vector<1x16x4xf32>
    %37 = vector.shape_cast %36 : vector<1x16x4xf32> to vector<16x4xf32>
    %38 = vector.extract_strided_slice %4 {offsets = [0, 36], sizes = [4, 286], strides = [1, 1]} : vector<4x324xf32> to vector<4x286xf32>
    %cst_30 = arith.constant dense<0.000000e+00> : vector<16x286xf32>
    %39 = tpu.matmul %37, %38, %cst_30 {dimension_numbers = #tpu.dot_dimension_numbers<[1], [0], [0], [1], [0, 0, 1, 1], [], []>} : vector<16x4xf32>, vector<4x286xf32>, vector<16x286xf32> -> vector<16x286xf32>
    %40 = arith.addf %35, %39 : vector<16x286xf32>
    %c7 = arith.constant 7 : index
    %c0_31 = arith.constant 0 : index
    %c0_32 = arith.constant 0 : index
    %41 = vector.load %arg2[%c7, %c0_31, %c0_32] : memref<9x16x4xf32, #tpu.memory_space<vmem>>, vector<1x16x4xf32>
    %42 = vector.shape_cast %41 : vector<1x16x4xf32> to vector<16x4xf32>
    %43 = vector.extract_strided_slice %4 {offsets = [0, 37], sizes = [4, 286], strides = [1, 1]} : vector<4x324xf32> to vector<4x286xf32>
    %cst_33 = arith.constant dense<0.000000e+00> : vector<16x286xf32>
    %44 = tpu.matmul %42, %43, %cst_33 {dimension_numbers = #tpu.dot_dimension_numbers<[1], [0], [0], [1], [0, 0, 1, 1], [], []>} : vector<16x4xf32>, vector<4x286xf32>, vector<16x286xf32> -> vector<16x286xf32>
    %45 = arith.addf %40, %44 : vector<16x286xf32>
    %c8 = arith.constant 8 : index
    %c0_34 = arith.constant 0 : index
    %c0_35 = arith.constant 0 : index
    %46 = vector.load %arg2[%c8, %c0_34, %c0_35] : memref<9x16x4xf32, #tpu.memory_space<vmem>>, vector<1x16x4xf32>
    %47 = vector.shape_cast %46 : vector<1x16x4xf32> to vector<16x4xf32>
    %48 = vector.extract_strided_slice %4 {offsets = [0, 38], sizes = [4, 286], strides = [1, 1]} : vector<4x324xf32> to vector<4x286xf32>
    %cst_36 = arith.constant dense<0.000000e+00> : vector<16x286xf32>
    %49 = tpu.matmul %47, %48, %cst_36 {dimension_numbers = #tpu.dot_dimension_numbers<[1], [0], [0], [1], [0, 0, 1, 1], [], []>} : vector<16x4xf32>, vector<4x286xf32>, vector<16x286xf32> -> vector<16x286xf32>
    %50 = arith.addf %45, %49 : vector<16x286xf32>
    %51 = vector.broadcast %0 : vector<16x1xf32> to vector<16x286xf32>
    %52 = arith.addf %50, %51 : vector<16x286xf32>
    %cst_37 = arith.constant 0.000000e+00 : f32
    %53 = vector.broadcast %cst_37 : f32 to vector<16x286xf32>
    %54 = arith.maximumf %52, %53 : vector<16x286xf32>
    %c0_38 = arith.constant 0 : index
    %c1_39 = arith.constant 1 : index
    %c0_40 = arith.constant 0 : index
    %c0_41 = arith.constant 0 : index
    %55 = vector.load %arg1[%c0_38, %c1_39, %c0_40, %c0_41] : memref<1x3x4x324xf32, #tpu.memory_space<vmem>>, vector<1x1x4x324xf32>
    %56 = vector.shape_cast %55 : vector<1x1x4x324xf32> to vector<4x324xf32>
    %cst_42 = arith.constant 0.000000e+00 : f32
    %57 = vector.broadcast %cst_42 : f32 to vector<16x286xf32>
    %c0_43 = arith.constant 0 : index
    %c0_44 = arith.constant 0 : index
    %c0_45 = arith.constant 0 : index
    %58 = vector.load %arg2[%c0_43, %c0_44, %c0_45] : memref<9x16x4xf32, #tpu.memory_space<vmem>>, vector<1x16x4xf32>
    %59 = vector.shape_cast %58 : vector<1x16x4xf32> to vector<16x4xf32>
    %60 = vector.extract_strided_slice %56 {offsets = [0, 0], sizes = [4, 286], strides = [1, 1]} : vector<4x324xf32> to vector<4x286xf32>
    %cst_46 = arith.constant dense<0.000000e+00> : vector<16x286xf32>
    %61 = tpu.matmul %59, %60, %cst_46 {dimension_numbers = #tpu.dot_dimension_numbers<[1], [0], [0], [1], [0, 0, 1, 1], [], []>} : vector<16x4xf32>, vector<4x286xf32>, vector<16x286xf32> -> vector<16x286xf32>
    %62 = arith.addf %57, %61 : vector<16x286xf32>
    %c1_47 = arith.constant 1 : index
    %c0_48 = arith.constant 0 : index
    %c0_49 = arith.constant 0 : index
    %63 = vector.load %arg2[%c1_47, %c0_48, %c0_49] : memref<9x16x4xf32, #tpu.memory_space<vmem>>, vector<1x16x4xf32>
    %64 = vector.shape_cast %63 : vector<1x16x4xf32> to vector<16x4xf32>
    %65 = vector.extract_strided_slice %56 {offsets = [0, 1], sizes = [4, 286], strides = [1, 1]} : vector<4x324xf32> to vector<4x286xf32>
    %cst_50 = arith.constant dense<0.000000e+00> : vector<16x286xf32>
    %66 = tpu.matmul %64, %65, %cst_50 {dimension_numbers = #tpu.dot_dimension_numbers<[1], [0], [0], [1], [0, 0, 1, 1], [], []>} : vector<16x4xf32>, vector<4x286xf32>, vector<16x286xf32> -> vector<16x286xf32>
    %67 = arith.addf %62, %66 : vector<16x286xf32>
    %c2_51 = arith.constant 2 : index
    %c0_52 = arith.constant 0 : index
    %c0_53 = arith.constant 0 : index
    %68 = vector.load %arg2[%c2_51, %c0_52, %c0_53] : memref<9x16x4xf32, #tpu.memory_space<vmem>>, vector<1x16x4xf32>
    %69 = vector.shape_cast %68 : vector<1x16x4xf32> to vector<16x4xf32>
    %70 = vector.extract_strided_slice %56 {offsets = [0, 2], sizes = [4, 286], strides = [1, 1]} : vector<4x324xf32> to vector<4x286xf32>
    %cst_54 = arith.constant dense<0.000000e+00> : vector<16x286xf32>
    %71 = tpu.matmul %69, %70, %cst_54 {dimension_numbers = #tpu.dot_dimension_numbers<[1], [0], [0], [1], [0, 0, 1, 1], [], []>} : vector<16x4xf32>, vector<4x286xf32>, vector<16x286xf32> -> vector<16x286xf32>
    %72 = arith.addf %67, %71 : vector<16x286xf32>
    %c3_55 = arith.constant 3 : index
    %c0_56 = arith.constant 0 : index
    %c0_57 = arith.constant 0 : index
    %73 = vector.load %arg2[%c3_55, %c0_56, %c0_57] : memref<9x16x4xf32, #tpu.memory_space<vmem>>, vector<1x16x4xf32>
    %74 = vector.shape_cast %73 : vector<1x16x4xf32> to vector<16x4xf32>
    %75 = vector.extract_strided_slice %56 {offsets = [0, 18], sizes = [4, 286], strides = [1, 1]} : vector<4x324xf32> to vector<4x286xf32>
    %cst_58 = arith.constant dense<0.000000e+00> : vector<16x286xf32>
    %76 = tpu.matmul %74, %75, %cst_58 {dimension_numbers = #tpu.dot_dimension_numbers<[1], [0], [0], [1], [0, 0, 1, 1], [], []>} : vector<16x4xf32>, vector<4x286xf32>, vector<16x286xf32> -> vector<16x286xf32>
    %77 = arith.addf %72, %76 : vector<16x286xf32>
    %c4_59 = arith.constant 4 : index
    %c0_60 = arith.constant 0 : index
    %c0_61 = arith.constant 0 : index
    %78 = vector.load %arg2[%c4_59, %c0_60, %c0_61] : memref<9x16x4xf32, #tpu.memory_space<vmem>>, vector<1x16x4xf32>
    %79 = vector.shape_cast %78 : vector<1x16x4xf32> to vector<16x4xf32>
    %80 = vector.extract_strided_slice %56 {offsets = [0, 19], sizes = [4, 286], strides = [1, 1]} : vector<4x324xf32> to vector<4x286xf32>
    %cst_62 = arith.constant dense<0.000000e+00> : vector<16x286xf32>
    %81 = tpu.matmul %79, %80, %cst_62 {dimension_numbers = #tpu.dot_dimension_numbers<[1], [0], [0], [1], [0, 0, 1, 1], [], []>} : vector<16x4xf32>, vector<4x286xf32>, vector<16x286xf32> -> vector<16x286xf32>
    %82 = arith.addf %77, %81 : vector<16x286xf32>
    %c5_63 = arith.constant 5 : index
    %c0_64 = arith.constant 0 : index
    %c0_65 = arith.constant 0 : index
    %83 = vector.load %arg2[%c5_63, %c0_64, %c0_65] : memref<9x16x4xf32, #tpu.memory_space<vmem>>, vector<1x16x4xf32>
    %84 = vector.shape_cast %83 : vector<1x16x4xf32> to vector<16x4xf32>
    %85 = vector.extract_strided_slice %56 {offsets = [0, 20], sizes = [4, 286], strides = [1, 1]} : vector<4x324xf32> to vector<4x286xf32>
    %cst_66 = arith.constant dense<0.000000e+00> : vector<16x286xf32>
    %86 = tpu.matmul %84, %85, %cst_66 {dimension_numbers = #tpu.dot_dimension_numbers<[1], [0], [0], [1], [0, 0, 1, 1], [], []>} : vector<16x4xf32>, vector<4x286xf32>, vector<16x286xf32> -> vector<16x286xf32>
    %87 = arith.addf %82, %86 : vector<16x286xf32>
    %c6_67 = arith.constant 6 : index
    %c0_68 = arith.constant 0 : index
    %c0_69 = arith.constant 0 : index
    %88 = vector.load %arg2[%c6_67, %c0_68, %c0_69] : memref<9x16x4xf32, #tpu.memory_space<vmem>>, vector<1x16x4xf32>
    %89 = vector.shape_cast %88 : vector<1x16x4xf32> to vector<16x4xf32>
    %90 = vector.extract_strided_slice %56 {offsets = [0, 36], sizes = [4, 286], strides = [1, 1]} : vector<4x324xf32> to vector<4x286xf32>
    %cst_70 = arith.constant dense<0.000000e+00> : vector<16x286xf32>
    %91 = tpu.matmul %89, %90, %cst_70 {dimension_numbers = #tpu.dot_dimension_numbers<[1], [0], [0], [1], [0, 0, 1, 1], [], []>} : vector<16x4xf32>, vector<4x286xf32>, vector<16x286xf32> -> vector<16x286xf32>
    %92 = arith.addf %87, %91 : vector<16x286xf32>
    %c7_71 = arith.constant 7 : index
    %c0_72 = arith.constant 0 : index
    %c0_73 = arith.constant 0 : index
    %93 = vector.load %arg2[%c7_71, %c0_72, %c0_73] : memref<9x16x4xf32, #tpu.memory_space<vmem>>, vector<1x16x4xf32>
    %94 = vector.shape_cast %93 : vector<1x16x4xf32> to vector<16x4xf32>
    %95 = vector.extract_strided_slice %56 {offsets = [0, 37], sizes = [4, 286], strides = [1, 1]} : vector<4x324xf32> to vector<4x286xf32>
    %cst_74 = arith.constant dense<0.000000e+00> : vector<16x286xf32>
    %96 = tpu.matmul %94, %95, %cst_74 {dimension_numbers = #tpu.dot_dimension_numbers<[1], [0], [0], [1], [0, 0, 1, 1], [], []>} : vector<16x4xf32>, vector<4x286xf32>, vector<16x286xf32> -> vector<16x286xf32>
    %97 = arith.addf %92, %96 : vector<16x286xf32>
    %c8_75 = arith.constant 8 : index
    %c0_76 = arith.constant 0 : index
    %c0_77 = arith.constant 0 : index
    %98 = vector.load %arg2[%c8_75, %c0_76, %c0_77] : memref<9x16x4xf32, #tpu.memory_space<vmem>>, vector<1x16x4xf32>
    %99 = vector.shape_cast %98 : vector<1x16x4xf32> to vector<16x4xf32>
    %100 = vector.extract_strided_slice %56 {offsets = [0, 38], sizes = [4, 286], strides = [1, 1]} : vector<4x324xf32> to vector<4x286xf32>
    %cst_78 = arith.constant dense<0.000000e+00> : vector<16x286xf32>
    %101 = tpu.matmul %99, %100, %cst_78 {dimension_numbers = #tpu.dot_dimension_numbers<[1], [0], [0], [1], [0, 0, 1, 1], [], []>} : vector<16x4xf32>, vector<4x286xf32>, vector<16x286xf32> -> vector<16x286xf32>
    %102 = arith.addf %97, %101 : vector<16x286xf32>
    %103 = vector.broadcast %0 : vector<16x1xf32> to vector<16x286xf32>
    %104 = arith.addf %102, %103 : vector<16x286xf32>
    %cst_79 = arith.constant 0.000000e+00 : f32
    %105 = vector.broadcast %cst_79 : f32 to vector<16x286xf32>
    %106 = arith.maximumf %104, %105 : vector<16x286xf32>
    %c0_80 = arith.constant 0 : index
    %c2_81 = arith.constant 2 : index
    %c0_82 = arith.constant 0 : index
    %c0_83 = arith.constant 0 : index
    %107 = vector.load %arg1[%c0_80, %c2_81, %c0_82, %c0_83] : memref<1x3x4x324xf32, #tpu.memory_space<vmem>>, vector<1x1x4x324xf32>
    %108 = vector.shape_cast %107 : vector<1x1x4x324xf32> to vector<4x324xf32>
    %cst_84 = arith.constant 0.000000e+00 : f32
    %109 = vector.broadcast %cst_84 : f32 to vector<16x286xf32>
    %c0_85 = arith.constant 0 : index
    %c0_86 = arith.constant 0 : index
    %c0_87 = arith.constant 0 : index
    %110 = vector.load %arg2[%c0_85, %c0_86, %c0_87] : memref<9x16x4xf32, #tpu.memory_space<vmem>>, vector<1x16x4xf32>
    %111 = vector.shape_cast %110 : vector<1x16x4xf32> to vector<16x4xf32>
    %112 = vector.extract_strided_slice %108 {offsets = [0, 0], sizes = [4, 286], strides = [1, 1]} : vector<4x324xf32> to vector<4x286xf32>
    %cst_88 = arith.constant dense<0.000000e+00> : vector<16x286xf32>
    %113 = tpu.matmul %111, %112, %cst_88 {dimension_numbers = #tpu.dot_dimension_numbers<[1], [0], [0], [1], [0, 0, 1, 1], [], []>} : vector<16x4xf32>, vector<4x286xf32>, vector<16x286xf32> -> vector<16x286xf32>
    %114 = arith.addf %109, %113 : vector<16x286xf32>
    %c1_89 = arith.constant 1 : index
    %c0_90 = arith.constant 0 : index
    %c0_91 = arith.constant 0 : index
    %115 = vector.load %arg2[%c1_89, %c0_90, %c0_91] : memref<9x16x4xf32, #tpu.memory_space<vmem>>, vector<1x16x4xf32>
    %116 = vector.shape_cast %115 : vector<1x16x4xf32> to vector<16x4xf32>
    %117 = vector.extract_strided_slice %108 {offsets = [0, 1], sizes = [4, 286], strides = [1, 1]} : vector<4x324xf32> to vector<4x286xf32>
    %cst_92 = arith.constant dense<0.000000e+00> : vector<16x286xf32>
    %118 = tpu.matmul %116, %117, %cst_92 {dimension_numbers = #tpu.dot_dimension_numbers<[1], [0], [0], [1], [0, 0, 1, 1], [], []>} : vector<16x4xf32>, vector<4x286xf32>, vector<16x286xf32> -> vector<16x286xf32>
    %119 = arith.addf %114, %118 : vector<16x286xf32>
    %c2_93 = arith.constant 2 : index
    %c0_94 = arith.constant 0 : index
    %c0_95 = arith.constant 0 : index
    %120 = vector.load %arg2[%c2_93, %c0_94, %c0_95] : memref<9x16x4xf32, #tpu.memory_space<vmem>>, vector<1x16x4xf32>
    %121 = vector.shape_cast %120 : vector<1x16x4xf32> to vector<16x4xf32>
    %122 = vector.extract_strided_slice %108 {offsets = [0, 2], sizes = [4, 286], strides = [1, 1]} : vector<4x324xf32> to vector<4x286xf32>
    %cst_96 = arith.constant dense<0.000000e+00> : vector<16x286xf32>
    %123 = tpu.matmul %121, %122, %cst_96 {dimension_numbers = #tpu.dot_dimension_numbers<[1], [0], [0], [1], [0, 0, 1, 1], [], []>} : vector<16x4xf32>, vector<4x286xf32>, vector<16x286xf32> -> vector<16x286xf32>
    %124 = arith.addf %119, %123 : vector<16x286xf32>
    %c3_97 = arith.constant 3 : index
    %c0_98 = arith.constant 0 : index
    %c0_99 = arith.constant 0 : index
    %125 = vector.load %arg2[%c3_97, %c0_98, %c0_99] : memref<9x16x4xf32, #tpu.memory_space<vmem>>, vector<1x16x4xf32>
    %126 = vector.shape_cast %125 : vector<1x16x4xf32> to vector<16x4xf32>
    %127 = vector.extract_strided_slice %108 {offsets = [0, 18], sizes = [4, 286], strides = [1, 1]} : vector<4x324xf32> to vector<4x286xf32>
    %cst_100 = arith.constant dense<0.000000e+00> : vector<16x286xf32>
    %128 = tpu.matmul %126, %127, %cst_100 {dimension_numbers = #tpu.dot_dimension_numbers<[1], [0], [0], [1], [0, 0, 1, 1], [], []>} : vector<16x4xf32>, vector<4x286xf32>, vector<16x286xf32> -> vector<16x286xf32>
    %129 = arith.addf %124, %128 : vector<16x286xf32>
    %c4_101 = arith.constant 4 : index
    %c0_102 = arith.constant 0 : index
    %c0_103 = arith.constant 0 : index
    %130 = vector.load %arg2[%c4_101, %c0_102, %c0_103] : memref<9x16x4xf32, #tpu.memory_space<vmem>>, vector<1x16x4xf32>
    %131 = vector.shape_cast %130 : vector<1x16x4xf32> to vector<16x4xf32>
    %132 = vector.extract_strided_slice %108 {offsets = [0, 19], sizes = [4, 286], strides = [1, 1]} : vector<4x324xf32> to vector<4x286xf32>
    %cst_104 = arith.constant dense<0.000000e+00> : vector<16x286xf32>
    %133 = tpu.matmul %131, %132, %cst_104 {dimension_numbers = #tpu.dot_dimension_numbers<[1], [0], [0], [1], [0, 0, 1, 1], [], []>} : vector<16x4xf32>, vector<4x286xf32>, vector<16x286xf32> -> vector<16x286xf32>
    %134 = arith.addf %129, %133 : vector<16x286xf32>
    %c5_105 = arith.constant 5 : index
    %c0_106 = arith.constant 0 : index
    %c0_107 = arith.constant 0 : index
    %135 = vector.load %arg2[%c5_105, %c0_106, %c0_107] : memref<9x16x4xf32, #tpu.memory_space<vmem>>, vector<1x16x4xf32>
    %136 = vector.shape_cast %135 : vector<1x16x4xf32> to vector<16x4xf32>
    %137 = vector.extract_strided_slice %108 {offsets = [0, 20], sizes = [4, 286], strides = [1, 1]} : vector<4x324xf32> to vector<4x286xf32>
    %cst_108 = arith.constant dense<0.000000e+00> : vector<16x286xf32>
    %138 = tpu.matmul %136, %137, %cst_108 {dimension_numbers = #tpu.dot_dimension_numbers<[1], [0], [0], [1], [0, 0, 1, 1], [], []>} : vector<16x4xf32>, vector<4x286xf32>, vector<16x286xf32> -> vector<16x286xf32>
    %139 = arith.addf %134, %138 : vector<16x286xf32>
    %c6_109 = arith.constant 6 : index
    %c0_110 = arith.constant 0 : index
    %c0_111 = arith.constant 0 : index
    %140 = vector.load %arg2[%c6_109, %c0_110, %c0_111] : memref<9x16x4xf32, #tpu.memory_space<vmem>>, vector<1x16x4xf32>
    %141 = vector.shape_cast %140 : vector<1x16x4xf32> to vector<16x4xf32>
    %142 = vector.extract_strided_slice %108 {offsets = [0, 36], sizes = [4, 286], strides = [1, 1]} : vector<4x324xf32> to vector<4x286xf32>
    %cst_112 = arith.constant dense<0.000000e+00> : vector<16x286xf32>
    %143 = tpu.matmul %141, %142, %cst_112 {dimension_numbers = #tpu.dot_dimension_numbers<[1], [0], [0], [1], [0, 0, 1, 1], [], []>} : vector<16x4xf32>, vector<4x286xf32>, vector<16x286xf32> -> vector<16x286xf32>
    %144 = arith.addf %139, %143 : vector<16x286xf32>
    %c7_113 = arith.constant 7 : index
    %c0_114 = arith.constant 0 : index
    %c0_115 = arith.constant 0 : index
    %145 = vector.load %arg2[%c7_113, %c0_114, %c0_115] : memref<9x16x4xf32, #tpu.memory_space<vmem>>, vector<1x16x4xf32>
    %146 = vector.shape_cast %145 : vector<1x16x4xf32> to vector<16x4xf32>
    %147 = vector.extract_strided_slice %108 {offsets = [0, 37], sizes = [4, 286], strides = [1, 1]} : vector<4x324xf32> to vector<4x286xf32>
    %cst_116 = arith.constant dense<0.000000e+00> : vector<16x286xf32>
    %148 = tpu.matmul %146, %147, %cst_116 {dimension_numbers = #tpu.dot_dimension_numbers<[1], [0], [0], [1], [0, 0, 1, 1], [], []>} : vector<16x4xf32>, vector<4x286xf32>, vector<16x286xf32> -> vector<16x286xf32>
    %149 = arith.addf %144, %148 : vector<16x286xf32>
    %c8_117 = arith.constant 8 : index
    %c0_118 = arith.constant 0 : index
    %c0_119 = arith.constant 0 : index
    %150 = vector.load %arg2[%c8_117, %c0_118, %c0_119] : memref<9x16x4xf32, #tpu.memory_space<vmem>>, vector<1x16x4xf32>
    %151 = vector.shape_cast %150 : vector<1x16x4xf32> to vector<16x4xf32>
    %152 = vector.extract_strided_slice %108 {offsets = [0, 38], sizes = [4, 286], strides = [1, 1]} : vector<4x324xf32> to vector<4x286xf32>
    %cst_120 = arith.constant dense<0.000000e+00> : vector<16x286xf32>
    %153 = tpu.matmul %151, %152, %cst_120 {dimension_numbers = #tpu.dot_dimension_numbers<[1], [0], [0], [1], [0, 0, 1, 1], [], []>} : vector<16x4xf32>, vector<4x286xf32>, vector<16x286xf32> -> vector<16x286xf32>
    %154 = arith.addf %149, %153 : vector<16x286xf32>
    %155 = vector.broadcast %0 : vector<16x1xf32> to vector<16x286xf32>
    %156 = arith.addf %154, %155 : vector<16x286xf32>
    %cst_121 = arith.constant 0.000000e+00 : f32
    %157 = vector.broadcast %cst_121 : f32 to vector<16x286xf32>
    %158 = arith.maximumf %156, %157 : vector<16x286xf32>
    %159 = vector.extract_strided_slice %54 {offsets = [0, 0], sizes = [8, 286], strides = [1, 1]} : vector<16x286xf32> to vector<8x286xf32>
    %160 = vector.extract_strided_slice %106 {offsets = [0, 0], sizes = [8, 286], strides = [1, 1]} : vector<16x286xf32> to vector<8x286xf32>
    %161 = arith.subf %159, %160 : vector<8x286xf32>
    %162 = arith.mulf %161, %161 : vector<8x286xf32>
    %163 = vector.broadcast %2 : vector<1x286xf32> to vector<8x286xf32>
    %164 = arith.mulf %162, %163 : vector<8x286xf32>
    %165 = vector.shape_cast %164 : vector<8x286xf32> to vector<1x8x286xf32>
    %cst_122 = arith.constant dense<0.000000e+00> : vector<1xf32>
    %166 = vector.multi_reduction <add>, %165, %cst_122 [1, 2] : vector<1x8x286xf32> to vector<1xf32>
    %167 = vector.shape_cast %166 : vector<1xf32> to vector<1x1x1xf32>
    %168 = vector.extract %167[0, 0, 0] : f32 from vector<1x1x1xf32>
    %169 = vector.extract_strided_slice %54 {offsets = [8, 0], sizes = [8, 286], strides = [1, 1]} : vector<16x286xf32> to vector<8x286xf32>
    %170 = vector.extract_strided_slice %158 {offsets = [8, 0], sizes = [8, 286], strides = [1, 1]} : vector<16x286xf32> to vector<8x286xf32>
    %171 = arith.mulf %169, %169 : vector<8x286xf32>
    %cst_123 = arith.constant dense<0.000000e+00> : vector<286xf32>
    %172 = vector.multi_reduction <add>, %171, %cst_123 [0] : vector<8x286xf32> to vector<286xf32>
    %173 = vector.shape_cast %172 : vector<286xf32> to vector<1x286xf32>
    %174 = math.sqrt %173 : vector<1x286xf32>
    %cst_124 = arith.constant 1.000000e-10 : f32
    %175 = vector.broadcast %cst_124 : f32 to vector<1x286xf32>
    %176 = arith.addf %174, %175 : vector<1x286xf32>
    %177 = tpu.reciprocal %176 {approx = true} : vector<1x286xf32> -> vector<1x286xf32>
    %178 = arith.mulf %170, %170 : vector<8x286xf32>
    %cst_125 = arith.constant dense<0.000000e+00> : vector<286xf32>
    %179 = vector.multi_reduction <add>, %178, %cst_125 [0] : vector<8x286xf32> to vector<286xf32>
    %180 = vector.shape_cast %179 : vector<286xf32> to vector<1x286xf32>
    %181 = math.sqrt %180 : vector<1x286xf32>
    %cst_126 = arith.constant 1.000000e-10 : f32
    %182 = vector.broadcast %cst_126 : f32 to vector<1x286xf32>
    %183 = arith.addf %181, %182 : vector<1x286xf32>
    %184 = tpu.reciprocal %183 {approx = true} : vector<1x286xf32> -> vector<1x286xf32>
    %185 = vector.broadcast %177 : vector<1x286xf32> to vector<8x286xf32>
    %186 = arith.mulf %169, %185 : vector<8x286xf32>
    %187 = vector.broadcast %184 : vector<1x286xf32> to vector<8x286xf32>
    %188 = arith.mulf %170, %187 : vector<8x286xf32>
    %189 = arith.subf %186, %188 : vector<8x286xf32>
    %190 = vector.broadcast %1 : vector<8x1xf32> to vector<8x286xf32>
    %191 = arith.mulf %190, %189 : vector<8x286xf32>
    %192 = arith.mulf %191, %189 : vector<8x286xf32>
    %cst_127 = arith.constant dense<0.000000e+00> : vector<286xf32>
    %193 = vector.multi_reduction <add>, %192, %cst_127 [0] : vector<8x286xf32> to vector<286xf32>
    %194 = vector.shape_cast %193 : vector<286xf32> to vector<1x286xf32>
    %195 = arith.mulf %194, %2 : vector<1x286xf32>
    %196 = vector.shape_cast %195 : vector<1x286xf32> to vector<1x1x286xf32>
    %cst_128 = arith.constant dense<0.000000e+00> : vector<1xf32>
    %197 = vector.multi_reduction <add>, %196, %cst_128 [1, 2] : vector<1x1x286xf32> to vector<1xf32>
    %198 = vector.shape_cast %197 : vector<1xf32> to vector<1x1x1xf32>
    %199 = vector.extract %198[0, 0, 0] : f32 from vector<1x1x1xf32>
    %cst_129 = arith.constant 3.906250e-03 : f32
    %200 = arith.mulf %199, %cst_129 : f32
    %201 = tpu.iota {dimensions = array<i32: 0>} : vector<8x128xi32>
    %c0_i32 = arith.constant 0 : i32
    %202 = vector.broadcast %c0_i32 : i32 to vector<8x128xi32>
    %203 = arith.cmpi eq, %201, %202 : vector<8x128xi32>
    %204 = vector.broadcast %168 : f32 to vector<8x128xf32>
    %205 = vector.broadcast %200 : f32 to vector<8x128xf32>
    %206 = arith.select %203, %204, %205 : vector<8x128xi1>, vector<8x128xf32>
    %c0_130 = arith.constant 0 : index
    %c0_131 = arith.constant 0 : index
    %c0_132 = arith.constant 0 : index
    %207 = vector.load %arg6[%c0_130, %c0_131, %c0_132] : memref<1x8x128xf32, #tpu.memory_space<vmem>>, vector<1x8x128xf32>
    %208 = vector.shape_cast %207 : vector<1x8x128xf32> to vector<8x128xf32>
    %209 = vector.shape_cast %206 : vector<8x128xf32> to vector<1x8x128xf32>
    tpu.vector_store %arg6[%c0_130, %c0_131, %c0_132], %209 {strides = array<i32>} : memref<1x8x128xf32, #tpu.memory_space<vmem>>, vector<1x8x128xf32>,
    return
  }
  func.func @transform_0(%arg0: i32) -> (i32, i32, i32, i32) {
    %c0_i32 = arith.constant 0 : i32
    %c0_i32_0 = arith.constant 0 : i32
    %c0_i32_1 = arith.constant 0 : i32
    %c0_i32_2 = arith.constant 0 : i32
    return %arg0, %c0_i32, %c0_i32_0, %c0_i32_1 : i32, i32, i32, i32
  }
  func.func @transform_1(%arg0: i32) -> (i32, i32, i32) {
    %c0_i32 = arith.constant 0 : i32
    %c0_i32_0 = arith.constant 0 : i32
    %c0_i32_1 = arith.constant 0 : i32
    %c0_i32_2 = arith.constant 0 : i32
    return %c0_i32, %c0_i32_0, %c0_i32_1 : i32, i32, i32
  }
  func.func @transform_2(%arg0: i32) -> (i32, i32) {
    %c0_i32 = arith.constant 0 : i32
    %c0_i32_0 = arith.constant 0 : i32
    %c0_i32_1 = arith.constant 0 : i32
    return %c0_i32, %c0_i32_0 : i32, i32
  }
  func.func @transform_3(%arg0: i32) -> (i32, i32) {
    %c0_i32 = arith.constant 0 : i32
    %c0_i32_0 = arith.constant 0 : i32
    %c0_i32_1 = arith.constant 0 : i32
    return %c0_i32, %c0_i32_0 : i32, i32
  }
  func.func @transform_4(%arg0: i32) -> (i32, i32) {
    %c0_i32 = arith.constant 0 : i32
    %c0_i32_0 = arith.constant 0 : i32
    %c0_i32_1 = arith.constant 0 : i32
    return %c0_i32, %c0_i32_0 : i32, i32
  }
  func.func @transform_5(%arg0: i32) -> (i32, i32, i32) {
    %c0_i32 = arith.constant 0 : i32
    %c0_i32_0 = arith.constant 0 : i32
    %c0_i32_1 = arith.constant 0 : i32
    return %arg0, %c0_i32, %c0_i32_0 : i32, i32, i32
  }
}

</mosaic_0001>

<bundles_post_ra>
// kernel: cloak_loss.1
= control target key start
LH: loop header
LB: loop body
LE: loop exit
PB: predicated region body
PF: predicated region fallthrough
CT: control target
= control target key end

     0   :  { %s5645_s18 = smov 0   ;;  %s6483_s0 = inlined_call_operand.vmem [shape: f32[2,3,4,324], index: 0, kind: input, shape index: {}]   ;;  %s6484_s1 = inlined_call_operand.vmem [shape: f32[9,16,4], index: 1, kind: input, shape index: {}]   ;;  %s6485_s2 = inlined_call_operand.vmem [shape: f32[16,1], index: 2, kind: input, shape index: {}]   ;;  %s6486_s3 = inlined_call_operand.vmem [shape: f32[8,1], index: 3, kind: input, shape index: {}]   ;;  %s6487_s4 = inlined_call_operand.vmem [shape: f32[1,286], index: 4, kind: input, shape index: {}]   ;;  %s6488_s5 = inlined_call_operand.vmem [shape: f32[2,8,128], index: 5, kind: output, shape index: {}]  }
   0x1 LB: > { %s5111_s19 = sadd.s32 4294967295, %s5603_s18   ;;  %p5115_p0 = scmp.ge.s32.totalorder %s5603_s18, 1  ;;  %s5603_s18 = sphi %s5645_s18, %s15_s18  }
   0x2   : > { %p187_p1 = scmp.lt.s32.totalorder %s5603_s18, 3 }
   0x4   : > { %p188_p2 = pnand %p5115_p0, %p187_p1 }
   0x5   : > { %p214_p3 = scmp.lt.s32.totalorder (!%p188_p2), %s5111_s19, 1  ;;  %s5606_s26 = smov (!%p188_p2), 127  }
   0x6   : > { %191 = sbr.rel (%p188_p2) target bundleno = 781 (0x30d), region = 40  ;;  %s5607_s27 = smov (!%p188_p2), 126  }
   0x7   : > { %s5608_s28 = smov (!%p188_p2), 110   ;;  %s5609_s29 = smov (!%p188_p2), 109  }
   0x8   : > { %s5610_s30 = smov (!%p188_p2), 108   ;;  %s5611_s6 = smov (!%p188_p2), 92  }
   0x9   : > { %s5612_s7 = smov (!%p188_p2), 91   ;;  %s5613_s8 = smov (!%p188_p2), 90  }
   0xb   : > { %v5656_v0 = vld [vmem:[%s6484_s1 + $0x10] sm:$0xff]  ;;  %vm246_vm0 = vcmask 31744   ;;  %s6490_s19 = smov (!%p214_p3, %s5111_s19), 1  ;;  %v5605_v1 = vmov 0.0   ;;  %v5614_v11 = vmov 0   ;;  %vm253_vm1 = vcmask 1043456  }
   0xc   : > { %5412 = vmatprep.mubr.msk.f32.mxu1 %vm246_vm0, %v5656_v0  ;;  %324 = vmatprep.mubr.f32.mxu0 %v5605_v1  ;;  %s5545_s22 = smul.u32 36, %s6490_s19  ;;  %vm243_vm2 = vcmask 1039360   ;;  %v5822_v16 = vld [vmem:[%s6484_s1 + $0x18] sm:$0xff]  ;;  %vm585_vm3 = vcmask 1031168   ;;  %v5841_v20 = vld [vmem:[%s6484_s1] sm:$0xff]  ;;  %vm767_vm4 = vcmask 900096  }
   0xd   : > { %5569 = vset.pattern.permute.xlu1 %v5614_v11  ;;  %5568 = vset.pattern.permute.xlu0 %v5614_v11  ;;  %v5860_v24 = vld [vmem:[%s6484_s1 + $0x8] sm:$0xff]  ;;  %v5867_v26 = vld [vmem:[%s6484_s1 + $0x20] sm:$0xff]  ;;  %vm949_vm5 = vcmask 891904   ;;  %v5902_v34 = vld [vmem:[%s6484_s1 + $0x30] sm:$0xff]  ;;  %vm1131_vm6 = vcmask 883712   ;;  %vm1313_vm7 = vcmask 752640  }
   0xe   : > { %s5667_s25 = scalar_lea.vmem %s6483_s0, %s5545_s22  ;;  %v5884_v30 = vld [vmem:[%s6484_s1 + $0x28] sm:$0xff]  ;;  %v5919_v38 = vld [vmem:[%s6484_s1 + $0x38] sm:$0xff]  ;;  %v5927_v40 = vld [vmem:[%s6484_s1 + $0x40] sm:$0xff]  ;;  %vm1495_vm8 = vcmask 744448   ;;  %vm1677_vm9 = vcmask 736256   ;;  %vm4882_vm10 = vcmask 244736  }
   0xf   : > { %v5670_v2 = vld [vmem:[%s5667_s25] sm:$0xff]  ;;  %v5681_v4 = vld [vmem:[%s5667_s25 + $0x8] sm:$0xf]  ;;  %v5722_v5 = vld [vmem:[%s5667_s25 + $0xc] sm:$0xff] }
  0x10   : > { %237 = vrot.lane.b32.xlu1 %v5670_v2, %s5606_s26  ;;  %v5676_v3 = vcombine.high %v5670_v2, %v5670_v2  ;;  %v5730_v6 = vcombine.high %v5722_v5, %v5722_v5  ;;  %v5735_v7 = vld [vmem:[%s5667_s25 + $0x14] sm:$0xf]  ;;  %v5782_v8 = vld [vmem:[%s5667_s25 + $0x18] sm:$0xff]  ;;  %v5787_v9 = vld [vmem:[%s5667_s25 + $0x20] sm:$0xf] }
  0x11   : > { %v5793_v10 = vcombine.high %v5782_v8, %v5782_v8  ;;  %v5945_v44 = vld [vmem:[%s6484_s1 + $0x48] sm:$0xff]  ;;  %v5963_v48 = vld [vmem:[%s6484_s1 + $0x50] sm:$0xff]  ;;  %v5981_v52 = vld [vmem:[%s6484_s1 + $0x58] sm:$0xff] }
  0x12   : > { %239 = vrot.lane.b32.xlu0 %v5676_v3, %s5606_s26  ;;  %v5996_v56 = vld [vmem:[%s6484_s1 + $0x60] sm:$0xff]  ;;  %v6004_v57 = vld [vmem:[%s6484_s1 + $0x68] sm:$0xff]  ;;  %v6023_v62 = vld [vmem:[%s6484_s1 + $0x70] sm:$0xff] }
  0x13   : > { %v6042_v11 = vld [vmem:[%s6484_s1 + $0x78] sm:$0xff] }
  0x14   : > { %581 = vrot.lane.b32.xlu1 %v5676_v3, %s5607_s27 }
  0x16   : > { %241 = vrot.lane.b32.xlu0 %v5681_v4, %s5606_s26 }
  0x18   : > { %579 = vrot.lane.b32.xlu1 %v5670_v2, %s5607_s27 }
  0x1a   : > { %583 = vrot.lane.b32.xlu0 %v5681_v4, %s5607_s27 }
  0x1c   : > { %763 = vrot.lane.b32.xlu1 %v5676_v3, %s5608_s28 }
  0x1e   : > { %765 = vrot.lane.b32.xlu0 %v5681_v4, %s5608_s28 }
  0x20   : > { %945 = vrot.lane.b32.xlu1 %v5676_v3, %s5609_s29 }
  0x22   : > { %761 = vrot.lane.b32.xlu0 %v5670_v2, %s5608_s28 }
  0x24   : > { %943 = vrot.lane.b32.xlu1 %v5670_v2, %s5609_s29 }
  0x26   : > { %947 = vrot.lane.b32.xlu0 %v5681_v4, %s5609_s29 }
  0x28   : > { %1127 = vrot.lane.b32.xlu1 %v5676_v3, %s5610_s30 }
  0x2a   : > { %1129 = vrot.lane.b32.xlu0 %v5681_v4, %s5610_s30 }
  0x2c   : > { %1309 = vrot.lane.b32.xlu1 %v5676_v3, %s5611_s6 }
  0x2e   : > { %1125 = vrot.lane.b32.xlu0 %v5670_v2, %s5610_s30 }
  0x30   : > { %1307 = vrot.lane.b32.xlu1 %v5670_v2, %s5611_s6 }
  0x32   : > { %1311 = vrot.lane.b32.xlu0 %v5681_v4, %s5611_s6 }
  0x34   : > { %1491 = vrot.lane.b32.xlu1 %v5676_v3, %s5612_s7 }
  0x36   : > { %1493 = vrot.lane.b32.xlu0 %v5681_v4, %s5612_s7 }
  0x38   : > { %1673 = vrot.lane.b32.xlu1 %v5676_v3, %s5613_s8 }
  0x3a   : > { %1489 = vrot.lane.b32.xlu0 %v5670_v2, %s5612_s7 }
  0x3c   : > { %1671 = vrot.lane.b32.xlu1 %v5670_v2, %s5613_s8 }
  0x3e   : > { %1675 = vrot.lane.b32.xlu0 %v5681_v4, %s5613_s8 }
  0x40   : > { %1880 = vrot.lane.b32.xlu1 %v5730_v6, %s5606_s26 }
  0x42   : > { %1882 = vrot.lane.b32.xlu0 %v5735_v7, %s5606_s26 }
  0x44   : > { %2200 = vrot.lane.b32.xlu1 %v5735_v7, %s5607_s27 }
  0x46   : > { %1878 = vrot.lane.b32.xlu0 %v5722_v5, %s5606_s26 }
  0x48   : > { %2196 = vrot.lane.b32.xlu1 %v5722_v5, %s5607_s27 }
  0x4a   : > { %2198 = vrot.lane.b32.xlu0 %v5730_v6, %s5607_s27 }
  0x4c   : > { %2366 = vrot.lane.b32.xlu1 %v5735_v7, %s5608_s28 }
  0x4e   : > { %2364 = vrot.lane.b32.xlu0 %v5730_v6, %s5608_s28 }
  0x50   : > { %2532 = vrot.lane.b32.xlu1 %v5735_v7, %s5609_s29 }
  0x52   : > { %2362 = vrot.lane.b32.xlu0 %v5722_v5, %s5608_s28 }
  0x54   : > { %2528 = vrot.lane.b32.xlu1 %v5722_v5, %s5609_s29 }
  0x56   : > { %2530 = vrot.lane.b32.xlu0 %v5730_v6, %s5609_s29 }
  0x58   : > { %2698 = vrot.lane.b32.xlu1 %v5735_v7, %s5610_s30 }
  0x5a   : > { %2696 = vrot.lane.b32.xlu0 %v5730_v6, %s5610_s30 }
  0x5c   : > { %2864 = vrot.lane.b32.xlu1 %v5735_v7, %s5611_s6 }
  0x5e   : > { %2694 = vrot.lane.b32.xlu0 %v5722_v5, %s5610_s30 }
  0x60   : > { %2860 = vrot.lane.b32.xlu1 %v5722_v5, %s5611_s6 }
  0x62   : > { %2862 = vrot.lane.b32.xlu0 %v5730_v6, %s5611_s6 }
  0x64   : > { %3030 = vrot.lane.b32.xlu1 %v5735_v7, %s5612_s7 }
  0x66   : > { %3028 = vrot.lane.b32.xlu0 %v5730_v6, %s5612_s7 }
  0x68   : > { %3196 = vrot.lane.b32.xlu1 %v5735_v7, %s5613_s8 }
  0x6a   : > { %3026 = vrot.lane.b32.xlu0 %v5722_v5, %s5612_s7 }
  0x6c   : > { %3192 = vrot.lane.b32.xlu1 %v5722_v5, %s5613_s8 }
  0x6e   : > { %3194 = vrot.lane.b32.xlu0 %v5730_v6, %s5613_s8 }
  0x70   : > { %3374 = vrot.lane.b32.xlu1 %v5787_v9, %s5606_s26 }
  0x72   : > { %3372 = vrot.lane.b32.xlu0 %v5793_v10, %s5606_s26 }
  0x74   : > { %3690 = vrot.lane.b32.xlu1 %v5793_v10, %s5607_s27 }
  0x76   : > { %3370 = vrot.lane.b32.xlu0 %v5782_v8, %s5606_s26 }
  0x78   : > { %3688 = vrot.lane.b32.xlu1 %v5782_v8, %s5607_s27 }
  0x7a   : > { %3692 = vrot.lane.b32.xlu0 %v5787_v9, %s5607_s27 }
  0x7c   : > { %3856 = vrot.lane.b32.xlu1 %v5793_v10, %s5608_s28 }
  0x7e   : > { %3858 = vrot.lane.b32.xlu0 %v5787_v9, %s5608_s28 }
  0x80   : > { %4022 = vrot.lane.b32.xlu1 %v5793_v10, %s5609_s29 }
  0x82   : > { %v238_v12 = vpop.permute.xlu1 %237  ;;  %3854 = vrot.lane.b32.xlu0 %v5782_v8, %s5608_s28 }
  0x84   : > { %v240_v13 = vpop.permute.xlu0 %239  ;;  %4020 = vrot.lane.b32.xlu1 %v5782_v8, %s5609_s29 }
  0x85   : > { %v244_v18 = vsel %vm243_vm2, %v238_v12, %v240_v13 }
  0x86   : > { %v582_v14 = vpop.permute.xlu1 %581  ;;  %4024 = vrot.lane.b32.xlu0 %v5787_v9, %s5609_s29 }
  0x88   : > { %v242_v15 = vpop.permute.xlu0 %241  ;;  %4188 = vrot.lane.b32.xlu1 %v5793_v10, %s5610_s30 }
  0x89   : > { %5410 = vmatprep.subr.msk.mxu1 %vm253_vm1, %v242_v15  ;;  %v245_v17 = vsel %vm243_vm2, %v240_v13, %v242_v15  ;;  %v6050_v13 = vld [vmem:[%s6484_s1 + $0x80] sm:$0xff] }
  0x8a   : > { %5120 = vmatprep.subr.msk.mxu0 %vm253_vm1, %v245_v17  ;;  %5411 = vmatpush3.msk.msra.mxu1 %vm253_vm1, %v242_v15  ;;  %v580_v19 = vpop.permute.xlu1 %579 }
  0x8b   : > { %5121 = vmatpush1.msk.msra.mxu0 %vm253_vm1, %v244_v18  ;;  %5413 = vmatmul.mubr.msk.f32.vlgmr.msra.gmra.mxu1 %vm246_vm0, %v5822_v16  ;;  %v586_v28 = vsel %vm585_vm3, %v580_v19, %v582_v14  ;;  %v224_v18 = vld [vmem:[%s6485_s2 + $0x8] sm:$0xff] }
  0x8c   : > { %5122 = vmatmul.mubr.msk.f32.vlgmr.msra.gmra.mxu0 %vm246_vm0, %v5656_v0  ;;  %5415 = vmatprep.subr.msk.mxu0 %vm253_vm1, %v5681_v4  ;;  %v584_v21 = vpop.permute.xlu0 %583  ;;  %v6068_v19 = vld [vmem:[%s6484_s1 + $0x88] sm:$0xff] }
  0x8d   : > { %5127 = vmatprep.subr.msk.mxu1 %vm253_vm1, %v5676_v3  ;;  %5416 = vmatpush3.msk.msra.mxu0 %vm253_vm1, %v5681_v4  ;;  %v587_v22 = vsel %vm585_vm3, %v582_v14, %v584_v21  ;;  %v225_v4 = vld [vmem:[%s6486_s3] sm:$0xff] }
  0x8e   : > { %5128 = vmatpush1.msk.msra.mxu1 %vm253_vm1, %v5670_v2  ;;  %488 = vmatprep.mubr.f32.mxu1 %v5605_v1  ;;  %v764_v23 = vpop.permute.xlu1 %763 }
  0x8f   : > { %330 = vmatprep.mubr.f32.mxu0 %v5605_v1  ;;  %5129 = vmatmul.mubr.msk.f32.vlgmr.msra.gmra.mxu1 %vm246_vm0, %v5841_v20 }
  0x90   : > { %5123 = vmatmul.mubr.msk.f32.gmra.mxu0 %vm246_vm0, %v5822_v16  ;;  %5136 = vmatprep.subr.msk.mxu0 %vm253_vm1, %v587_v22  ;;  %v766_v25 = vpop.permute.xlu0 %765  ;;  %v223_v22 = vld [vmem:[%s6485_s2] sm:$0xff] }
  0x91   : > { %494 = vmatprep.mubr.f32.mxu1 %v5605_v1  ;;  %5420 = vmatprep.subr.msk.mxu1 %vm253_vm1, %v584_v21  ;;  %v769_v27 = vsel %vm767_vm4, %v764_v23, %v766_v25 }
  0x92   : > { %5417 = vmatprep.mubr.msk.f32.mxu0 %vm246_vm0, %v5841_v20  ;;  %5421 = vmatpush3.msk.msra.mxu1 %vm253_vm1, %v584_v21  ;;  %v946_v29 = vpop.permute.xlu1 %945 }
  0x93   : > { %5130 = vmatmul.mubr.msk.f32.gmra.mxu1 %vm246_vm0, %v5860_v24  ;;  %5145 = vmatprep.subr.msk.mxu1 %vm253_vm1, %v769_v27 }
  0x94   : > { %5418 = vmatmul.mubr.msk.f32.vlgmr.msra.gmra.mxu0 %vm246_vm0, %v5860_v24  ;;  %5422 = vmatprep.mubr.msk.f32.mxu1 %vm246_vm0, %v5867_v26  ;;  %v762_v31 = vpop.permute.xlu0 %761 }
  0x95   : > { %5137 = vmatpush1.msk.msra.mxu0 %vm253_vm1, %v586_v28  ;;  %664 = vmatprep.mubr.f32.mxu0 %v5605_v1  ;;  %v768_v32 = vsel %vm767_vm4, %v762_v31, %v764_v23 }
  0x96   : > { %5425 = vmatprep.subr.msk.mxu0 %vm253_vm1, %v766_v25  ;;  %4190 = vrot.lane.b32.xlu0 %v5787_v9, %s5610_s30  ;;  %v944_v33 = vpop.permute.xlu1 %943 }
  0x97   : > { %5423 = vmatmul.mubr.msk.f32.vlgmr.msra.gmra.mxu1 %vm246_vm0, %v5884_v30  ;;  %4354 = vrot.lane.b32.xlu1 %v5793_v10, %s5611_s6  ;;  %v950_v41 = vsel %vm949_vm5, %v944_v33, %v946_v29 }
  0x98   : > { %5138 = vmatmul.mubr.msk.f32.vlgmr.msra.gmra.mxu0 %vm246_vm0, %v5867_v26  ;;  %5146 = vmatpush1.msk.msra.mxu1 %vm253_vm1, %v768_v32  ;;  %v948_v35 = vpop.permute.xlu0 %947 }
  0x99   : > { %5426 = vmatpush3.msk.msra.mxu0 %vm253_vm1, %v766_v25  ;;  %846 = vmatprep.mubr.f32.mxu1 %v5605_v1  ;;  %v951_v36 = vsel %vm949_vm5, %v946_v29, %v948_v35 }
  0x9a   : > { %670 = vmatprep.mubr.f32.mxu0 %v5605_v1  ;;  %4186 = vrot.lane.b32.xlu0 %v5782_v8, %s5610_s30  ;;  %v1128_v37 = vpop.permute.xlu1 %1127 }
  0x9b   : > { %5147 = vmatmul.mubr.msk.f32.vlgmr.msra.gmra.mxu1 %vm246_vm0, %v5902_v34  ;;  %5154 = vmatprep.subr.msk.mxu0 %vm253_vm1, %v951_v36 }
  0x9c   : > { %5139 = vmatmul.mubr.msk.f32.gmra.mxu0 %vm246_vm0, %v5884_v30  ;;  %852 = vmatprep.mubr.f32.mxu1 %v5605_v1  ;;  %v1130_v39 = vpop.permute.xlu0 %1129 }
  0x9d   : > { %5430 = vmatprep.subr.msk.mxu1 %vm253_vm1, %v948_v35  ;;  %5427 = vmatprep.mubr.msk.f32.mxu0 %vm246_vm0, %v5902_v34  ;;  %v1133_v43 = vsel %vm1131_vm6, %v1128_v37, %v1130_v39 }
  0x9e   : > { %5431 = vmatpush3.msk.msra.mxu1 %vm253_vm1, %v948_v35  ;;  %4352 = vrot.lane.b32.xlu1 %v5782_v8, %s5611_s6  ;;  %v1310_v42 = vpop.permute.xlu1 %1309 }
  0x9f   : > { %5148 = vmatmul.mubr.msk.f32.gmra.mxu1 %vm246_vm0, %v5919_v38  ;;  %4356 = vrot.lane.b32.xlu0 %v5787_v9, %s5611_s6  ;;  %s5117_s6 = sshll.u32 %s6490_s19, 3 }
  0xa0   : > { %5428 = vmatmul.mubr.msk.f32.vlgmr.msra.gmra.mxu0 %vm246_vm0, %v5919_v38  ;;  %5432 = vmatprep.mubr.msk.f32.mxu1 %vm246_vm0, %v5927_v40  ;;  %v1126_v45 = vpop.permute.xlu0 %1125  ;;  %s222_s12 = scalar_lea.vmem %s6488_s5, %s5117_s6 }
  0xa1   : > { %5155 = vmatpush1.msk.msra.mxu0 %vm253_vm1, %v950_v41  ;;  %1028 = vmatprep.mubr.f32.mxu0 %v5605_v1  ;;  %v1132_v46 = vsel %vm1131_vm6, %v1126_v45, %v1128_v37 }
  0xa2   : > { %5435 = vmatprep.subr.msk.mxu0 %vm253_vm1, %v1130_v39  ;;  %5163 = vmatprep.subr.msk.mxu1 %vm253_vm1, %v1133_v43  ;;  %v1308_v47 = vpop.permute.xlu1 %1307 }
  0xa3   : > { %5433 = vmatmul.mubr.msk.f32.vlgmr.msra.gmra.mxu1 %vm246_vm0, %v5945_v44  ;;  %4520 = vrot.lane.b32.xlu1 %v5793_v10, %s5612_s7  ;;  %v1314_v54 = vsel %vm1313_vm7, %v1308_v47, %v1310_v42 }
  0xa4   : > { %5156 = vmatmul.mubr.msk.f32.vlgmr.msra.gmra.mxu0 %vm246_vm0, %v5927_v40  ;;  %4522 = vrot.lane.b32.xlu0 %v5787_v9, %s5612_s7  ;;  %v1312_v49 = vpop.permute.xlu0 %1311 }
  0xa5   : > { %5436 = vmatpush3.msk.msra.mxu0 %vm253_vm1, %v1130_v39  ;;  %5164 = vmatpush1.msk.msra.mxu1 %vm253_vm1, %v1132_v46  ;;  %v1315_v50 = vsel %vm1313_vm7, %v1310_v42, %v1312_v49 }
  0xa6   : > { %1210 = vmatprep.mubr.f32.mxu1 %v5605_v1  ;;  %1034 = vmatprep.mubr.f32.mxu0 %v5605_v1  ;;  %v1492_v51 = vpop.permute.xlu1 %1491 }
  0xa7   : > { %5165 = vmatmul.mubr.msk.f32.vlgmr.msra.gmra.mxu1 %vm246_vm0, %v5963_v48  ;;  %4686 = vrot.lane.b32.xlu1 %v5793_v10, %s5613_s8 }
  0xa8   : > { %5157 = vmatmul.mubr.msk.f32.gmra.mxu0 %vm246_vm0, %v5945_v44  ;;  %4518 = vrot.lane.b32.xlu0 %v5782_v8, %s5612_s7  ;;  %v1494_v53 = vpop.permute.xlu0 %1493 }
  0xa9   : > { %5172 = vmatprep.subr.msk.mxu0 %vm253_vm1, %v1315_v50  ;;  %1216 = vmatprep.mubr.f32.mxu1 %v5605_v1  ;;  %v1497_v59 = vsel %vm1495_vm8, %v1492_v51, %v1494_v53 }
  0xaa   : > { %5440 = vmatprep.subr.msk.mxu1 %vm253_vm1, %v1312_v49  ;;  %5437 = vmatprep.mubr.msk.f32.mxu0 %vm246_vm0, %v5963_v48  ;;  %v1674_v55 = vpop.permute.xlu1 %1673 }
  0xab   : > { %5166 = vmatmul.mubr.msk.f32.gmra.mxu1 %vm246_vm0, %v5981_v52  ;;  %4684 = vrot.lane.b32.xlu1 %v5782_v8, %s5613_s8 }
  0xac   : > { %5441 = vmatpush3.msk.msra.mxu1 %vm253_vm1, %v1312_v49  ;;  %5438 = vmatmul.mubr.msk.f32.vlgmr.msra.gmra.mxu0 %vm246_vm0, %v5981_v52  ;;  %v1490_v58 = vpop.permute.xlu0 %1489 }
  0xad   : > { %5173 = vmatpush1.msk.msra.mxu0 %vm253_vm1, %v1314_v54  ;;  %4688 = vrot.lane.b32.xlu0 %v5787_v9, %s5613_s8  ;;  %v1496_v60 = vsel %vm1495_vm8, %v1490_v58, %v1492_v51 }
  0xae   : > { %5442 = vmatprep.mubr.msk.f32.mxu1 %vm246_vm0, %v5996_v56  ;;  %1392 = vmatprep.mubr.f32.mxu0 %v5605_v1  ;;  %v1672_v61 = vpop.permute.xlu1 %1671 }
  0xaf   : > { %5443 = vmatmul.mubr.msk.f32.vlgmr.msra.gmra.mxu1 %vm246_vm0, %v6004_v57  ;;  %5445 = vmatprep.subr.msk.mxu0 %vm253_vm1, %v1494_v53  ;;  %v1678_v15 = vsel %vm1677_vm9, %v1672_v61, %v1674_v55 }
  0xb0   : > { %5174 = vmatmul.mubr.msk.f32.vlgmr.msra.gmra.mxu0 %vm246_vm0, %v5996_v56  ;;  %5181 = vmatprep.subr.msk.mxu1 %vm253_vm1, %v1497_v59  ;;  %v1676_v63 = vpop.permute.xlu0 %1675 }
  0xb1   : > { %5446 = vmatpush3.msk.msra.mxu0 %vm253_vm1, %v1494_v53  ;;  %5182 = vmatpush1.msk.msra.mxu1 %vm253_vm1, %v1496_v60  ;;  %v1679_v2 = vsel %vm1677_vm9, %v1674_v55, %v1676_v63 }
  0xb2   : > { %1574 = vmatprep.mubr.f32.mxu1 %v5605_v1  ;;  %1398 = vmatprep.mubr.f32.mxu0 %v5605_v1  ;;  %v1881_v3 = vpop.permute.xlu1 %1880 }
  0xb3   : > { %5183 = vmatmul.mubr.msk.f32.vlgmr.msra.gmra.mxu1 %vm246_vm0, %v6023_v62  ;;  %5190 = vmatprep.subr.msk.mxu0 %vm253_vm1, %v1679_v2 }
  0xb4   : > { %5175 = vmatmul.mubr.msk.f32.gmra.mxu0 %vm246_vm0, %v6004_v57  ;;  %1580 = vmatprep.mubr.f32.mxu1 %v5605_v1  ;;  %v1883_v12 = vpop.permute.xlu0 %1882 }
  0xb5   : > { %5450 = vmatprep.subr.msk.mxu1 %vm253_vm1, %v1676_v63  ;;  %5447 = vmatprep.mubr.msk.f32.mxu0 %vm246_vm0, %v6023_v62  ;;  %v1885_v14 = vsel %vm243_vm2, %v1881_v3, %v1883_v12 }
  0xb6   : > { %5451 = vmatpush3.msk.msra.mxu1 %vm253_vm1, %v1676_v63  ;;  %v2201_v17 = vpop.permute.xlu1 %2200  ;;  %5003 = vperm.xlu1 %5569, %v225_v4  }
  0xb7   : > { %5184 = vmatmul.mubr.msk.f32.gmra.mxu1 %vm246_vm0, %v6042_v11  ;;  %5199 = vmatprep.subr.msk.mxu1 %vm253_vm1, %v1885_v14 }
  0xb8   : > { %5448 = vmatmul.mubr.msk.f32.vlgmr.msra.gmra.mxu0 %vm246_vm0, %v6042_v11  ;;  %5452 = vmatprep.mubr.msk.f32.mxu1 %vm246_vm0, %v6050_v13  ;;  %v1879_v21 = vpop.permute.xlu0 %1878 }
  0xb9   : > { %5191 = vmatpush1.msk.msra.mxu0 %vm253_vm1, %v1678_v15  ;;  %1756 = vmatprep.mubr.f32.mxu0 %v5605_v1  ;;  %v1884_v23 = vsel %vm243_vm2, %v1879_v21, %v1881_v3 }
  0xba   : > { %5455 = vmatprep.subr.msk.mxu0 %vm253_vm1, %v1883_v12  ;;  %v2197_v25 = vpop.permute.xlu1 %2196  ;;  %1857 = vperm.xlu0 %5568, %v224_v18  }
  0xbb   : > { %5453 = vmatmul.mubr.msk.f32.vlgmr.msra.gmra.mxu1 %vm246_vm0, %v6068_v19  ;;  %1852 = vperm.xlu1 %5569, %v223_v22  }
  0xbc   : > { %5192 = vmatmul.mubr.msk.f32.vlgmr.msra.gmra.mxu0 %vm246_vm0, %v6050_v13  ;;  %5200 = vmatpush1.msk.msra.mxu1 %vm253_vm1, %v1884_v23  ;;  %v2199_v27 = vpop.permute.xlu0 %2198 }
  0xbd   : > { %5456 = vmatpush3.msk.msra.mxu0 %vm253_vm1, %v1883_v12  ;;  %1956 = vmatprep.mubr.f32.mxu1 %v5605_v1  ;;  %v2203_v29 = vsel %vm585_vm3, %v2199_v27, %v2201_v17  ;;  %v2202_v33 = vsel %vm585_vm3, %v2197_v25, %v2199_v27 }
  0xbe   : > { %1762 = vmatprep.mubr.f32.mxu0 %v5605_v1  ;;  %5206 = vmatprep.subr.msk.mxu0 %vm253_vm1, %v5730_v6  ;;  %v2367_v28 = vpop.permute.xlu1 %2366 }
  0xbf   : > { %5201 = vmatmul.mubr.msk.f32.vlgmr.msra.gmra.mxu1 %vm246_vm0, %v5656_v0  ;;  %5460 = vmatprep.subr.msk.mxu1 %vm253_vm1, %v5735_v7 }
  0xc0   : > { %5193 = vmatmul.mubr.msk.f32.gmra.mxu0 %vm246_vm0, %v6068_v19  ;;  %1962 = vmatprep.mubr.f32.mxu1 %v5605_v1  ;;  %v2365_v31 = vpop.permute.xlu0 %2364 }
  0xc1   : > { %5457 = vmatprep.mubr.msk.f32.mxu0 %vm246_vm0, %v5656_v0  ;;  %5461 = vmatpush3.msk.msra.mxu1 %vm253_vm1, %v5735_v7  ;;  %v2369_v35 = vsel %vm767_vm4, %v2365_v31, %v2367_v28 }
  0xc2   : > { %5213 = vmatprep.subr.msk.mxu1 %vm253_vm1, %v2203_v29  ;;  %v2533_v6 = vpop.permute.xlu1 %2532 }
  0xc3   : > { %5202 = vmatmul.mubr.msk.f32.gmra.mxu1 %vm246_vm0, %v5822_v16 }
  0xc4   : > { %5458 = vmatmul.mubr.msk.f32.vlgmr.msra.gmra.mxu0 %vm246_vm0, %v5822_v16  ;;  %5462 = vmatprep.mubr.msk.f32.mxu1 %vm246_vm0, %v5841_v20  ;;  %v2363_v32 = vpop.permute.xlu0 %2362 }
  0xc5   : > { %5207 = vmatpush1.msk.msra.mxu0 %vm253_vm1, %v5722_v5  ;;  %2111 = vmatprep.mubr.f32.mxu0 %v5605_v1  ;;  %v2368_v41 = vsel %vm767_vm4, %v2363_v32, %v2365_v31 }
  0xc6   : > { %5465 = vmatprep.subr.msk.mxu0 %vm253_vm1, %v2201_v17  ;;  %v2529_v7 = vpop.permute.xlu1 %2528 }
  0xc7   : > { %5463 = vmatmul.mubr.msk.f32.vlgmr.msra.gmra.mxu1 %vm246_vm0, %v5860_v24 }
  0xc8   : > { %5208 = vmatmul.mubr.msk.f32.vlgmr.msra.gmra.mxu0 %vm246_vm0, %v5841_v20  ;;  %5214 = vmatpush1.msk.msra.mxu1 %vm253_vm1, %v2202_v33  ;;  %v2531_v36 = vpop.permute.xlu0 %2530 }
  0xc9   : > { %5466 = vmatpush3.msk.msra.mxu0 %vm253_vm1, %v2201_v17  ;;  %2274 = vmatprep.mubr.f32.mxu1 %v5605_v1  ;;  %v2535_v37 = vsel %vm949_vm5, %v2531_v36, %v2533_v6  ;;  %v2534_v45 = vsel %vm949_vm5, %v2529_v7, %v2531_v36 }
  0xca   : > { %2117 = vmatprep.mubr.f32.mxu0 %v5605_v1  ;;  %5220 = vmatprep.subr.msk.mxu0 %vm253_vm1, %v2369_v35  ;;  %v2699_v5 = vpop.permute.xlu1 %2698 }
  0xcb   : > { %5215 = vmatmul.mubr.msk.f32.vlgmr.msra.gmra.mxu1 %vm246_vm0, %v5867_v26  ;;  %5470 = vmatprep.subr.msk.mxu1 %vm253_vm1, %v2367_v28 }
  0xcc   : > { %5209 = vmatmul.mubr.msk.f32.gmra.mxu0 %vm246_vm0, %v5860_v24  ;;  %2280 = vmatprep.mubr.f32.mxu1 %v5605_v1  ;;  %v2697_v39 = vpop.permute.xlu0 %2696 }
  0xcd   : > { %5467 = vmatprep.mubr.msk.f32.mxu0 %vm246_vm0, %v5867_v26  ;;  %5471 = vmatpush3.msk.msra.mxu1 %vm253_vm1, %v2367_v28  ;;  %v2701_v47 = vsel %vm1131_vm6, %v2697_v39, %v2699_v5 }
  0xce   : > { %5227 = vmatprep.subr.msk.mxu1 %vm253_vm1, %v2535_v37  ;;  %v2865_v42 = vpop.permute.xlu1 %2864 }
  0xcf   : > { %5216 = vmatmul.mubr.msk.f32.gmra.mxu1 %vm246_vm0, %v5884_v30 }
  0xd0   : > { %5468 = vmatmul.mubr.msk.f32.vlgmr.msra.gmra.mxu0 %vm246_vm0, %v5884_v30  ;;  %5472 = vmatprep.mubr.msk.f32.mxu1 %vm246_vm0, %v5902_v34  ;;  %v2695_v43 = vpop.permute.xlu0 %2694 }
  0xd1   : > { %5221 = vmatpush1.msk.msra.mxu0 %vm253_vm1, %v2368_v41  ;;  %2440 = vmatprep.mubr.f32.mxu0 %v5605_v1  ;;  %v2700_v54 = vsel %vm1131_vm6, %v2695_v43, %v2697_v39 }
  0xd2   : > { %5475 = vmatprep.subr.msk.mxu0 %vm253_vm1, %v2533_v6  ;;  %v2861_v46 = vpop.permute.xlu1 %2860 }
  0xd3   : > { %5473 = vmatmul.mubr.msk.f32.vlgmr.msra.gmra.mxu1 %vm246_vm0, %v5919_v38 }
  0xd4   : > { %5222 = vmatmul.mubr.msk.f32.vlgmr.msra.gmra.mxu0 %vm246_vm0, %v5902_v34  ;;  %5228 = vmatpush1.msk.msra.mxu1 %vm253_vm1, %v2534_v45  ;;  %v2863_v49 = vpop.permute.xlu0 %2862 }
  0xd5   : > { %5476 = vmatpush3.msk.msra.mxu0 %vm253_vm1, %v2533_v6  ;;  %2606 = vmatprep.mubr.f32.mxu1 %v5605_v1  ;;  %v2867_v51 = vsel %vm1313_vm7, %v2863_v49, %v2865_v42  ;;  %v2866_v59 = vsel %vm1313_vm7, %v2861_v46, %v2863_v49 }
  0xd6   : > { %2446 = vmatprep.mubr.f32.mxu0 %v5605_v1  ;;  %5234 = vmatprep.subr.msk.mxu0 %vm253_vm1, %v2701_v47  ;;  %v3031_v50 = vpop.permute.xlu1 %3030 }
  0xd7   : > { %5229 = vmatmul.mubr.msk.f32.vlgmr.msra.gmra.mxu1 %vm246_vm0, %v5927_v40  ;;  %5480 = vmatprep.subr.msk.mxu1 %vm253_vm1, %v2699_v5 }
  0xd8   : > { %5223 = vmatmul.mubr.msk.f32.gmra.mxu0 %vm246_vm0, %v5919_v38  ;;  %2612 = vmatprep.mubr.f32.mxu1 %v5605_v1  ;;  %v3029_v53 = vpop.permute.xlu0 %3028 }
  0xd9   : > { %5477 = vmatprep.mubr.msk.f32.mxu0 %vm246_vm0, %v5927_v40  ;;  %5481 = vmatpush3.msk.msra.mxu1 %vm253_vm1, %v2699_v5  ;;  %v3033_v61 = vsel %vm1495_vm8, %v3029_v53, %v3031_v50 }
  0xda   : > { %5241 = vmatprep.subr.msk.mxu1 %vm253_vm1, %v2867_v51  ;;  %v3197_v55 = vpop.permute.xlu1 %3196 }
  0xdb   : > { %5230 = vmatmul.mubr.msk.f32.gmra.mxu1 %vm246_vm0, %v5945_v44 }
  0xdc   : > { %5478 = vmatmul.mubr.msk.f32.vlgmr.msra.gmra.mxu0 %vm246_vm0, %v5945_v44  ;;  %5482 = vmatprep.mubr.msk.f32.mxu1 %vm246_vm0, %v5963_v48  ;;  %v3027_v58 = vpop.permute.xlu0 %3026 }
  0xdd   : > { %5235 = vmatpush1.msk.msra.mxu0 %vm253_vm1, %v2700_v54  ;;  %2772 = vmatprep.mubr.f32.mxu0 %v5605_v1  ;;  %v3032_v12 = vsel %vm1495_vm8, %v3027_v58, %v3029_v53 }
  0xde   : > { %5485 = vmatprep.subr.msk.mxu0 %vm253_vm1, %v2865_v42  ;;  %v3193_v60 = vpop.permute.xlu1 %3192 }
  0xdf   : > { %5483 = vmatmul.mubr.msk.f32.vlgmr.msra.gmra.mxu1 %vm246_vm0, %v5981_v52 }
  0xe0   : > { %5236 = vmatmul.mubr.msk.f32.vlgmr.msra.gmra.mxu0 %vm246_vm0, %v5963_v48  ;;  %5242 = vmatpush1.msk.msra.mxu1 %vm253_vm1, %v2866_v59  ;;  %v3195_v63 = vpop.permute.xlu0 %3194 }
  0xe1   : > { %5486 = vmatpush3.msk.msra.mxu0 %vm253_vm1, %v2865_v42  ;;  %2938 = vmatprep.mubr.f32.mxu1 %v5605_v1  ;;  %v3199_v3 = vsel %vm1677_vm9, %v3195_v63, %v3197_v55  ;;  %v3198_v15 = vsel %vm1677_vm9, %v3193_v60, %v3195_v63 }
  0xe2   : > { %2778 = vmatprep.mubr.f32.mxu0 %v5605_v1  ;;  %5248 = vmatprep.subr.msk.mxu0 %vm253_vm1, %v3033_v61  ;;  %v3375_v2 = vpop.permute.xlu1 %3374 }
  0xe3   : > { %5243 = vmatmul.mubr.msk.f32.vlgmr.msra.gmra.mxu1 %vm246_vm0, %v5996_v56  ;;  %5490 = vmatprep.subr.msk.mxu1 %vm253_vm1, %v3031_v50 }
  0xe4   : > { %5237 = vmatmul.mubr.msk.f32.gmra.mxu0 %vm246_vm0, %v5981_v52  ;;  %2944 = vmatprep.mubr.f32.mxu1 %v5605_v1  ;;  %v3373_v4 = vpop.permute.xlu0 %3372 }
  0xe5   : > { %5487 = vmatprep.mubr.msk.f32.mxu0 %vm246_vm0, %v5996_v56  ;;  %5491 = vmatpush3.msk.msra.mxu1 %vm253_vm1, %v3031_v50  ;;  %v3377_v18 = vsel %vm243_vm2, %v3373_v4, %v3375_v2 }
  0xe6   : > { %5255 = vmatprep.subr.msk.mxu1 %vm253_vm1, %v3199_v3  ;;  %v3691_v14 = vpop.permute.xlu1 %3690 }
  0xe7   : > { %5244 = vmatmul.mubr.msk.f32.gmra.mxu1 %vm246_vm0, %v6004_v57 }
  0xe8   : > { %5488 = vmatmul.mubr.msk.f32.vlgmr.msra.gmra.mxu0 %vm246_vm0, %v6004_v57  ;;  %5492 = vmatprep.mubr.msk.f32.mxu1 %vm246_vm0, %v6023_v62  ;;  %v3371_v17 = vpop.permute.xlu0 %3370 }
  0xe9   : > { %5249 = vmatpush1.msk.msra.mxu0 %vm253_vm1, %v3032_v12  ;;  %3104 = vmatprep.mubr.f32.mxu0 %v5605_v1  ;;  %v3376_v23 = vsel %vm243_vm2, %v3371_v17, %v3373_v4 }
  0xea   : > { %5495 = vmatprep.subr.msk.mxu0 %vm253_vm1, %v3197_v55  ;;  %v3689_v21 = vpop.permute.xlu1 %3688 }
  0xeb   : > { %5493 = vmatmul.mubr.msk.f32.vlgmr.msra.gmra.mxu1 %vm246_vm0, %v6042_v11 }
  0xec   : > { %5250 = vmatmul.mubr.msk.f32.vlgmr.msra.gmra.mxu0 %vm246_vm0, %v6023_v62  ;;  %5256 = vmatpush1.msk.msra.mxu1 %vm253_vm1, %v3198_v15  ;;  %v3693_v22 = vpop.permute.xlu0 %3692 }
  0xed   : > { %5496 = vmatpush3.msk.msra.mxu0 %vm253_vm1, %v3197_v55  ;;  %3270 = vmatprep.mubr.f32.mxu1 %v5605_v1 }
  0xee   : > { %3110 = vmatprep.mubr.f32.mxu0 %v5605_v1  ;;  %5264 = vmatprep.subr.msk.mxu0 %vm253_vm1, %v3377_v18  ;;  %v3857_v25 = vpop.permute.xlu1 %3856 }
  0xef   : > { %5257 = vmatmul.mubr.msk.f32.vlgmr.msra.gmra.mxu1 %vm246_vm0, %v6050_v13  ;;  %5500 = vmatprep.subr.msk.mxu1 %vm253_vm1, %v3375_v2 }
  0xf0   : > { %5251 = vmatmul.mubr.msk.f32.gmra.mxu0 %vm246_vm0, %v6042_v11  ;;  %3276 = vmatprep.mubr.f32.mxu1 %v5605_v1  ;;  %v3859_v27 = vpop.permute.xlu0 %3858 }
  0xf1   : > { %5497 = vmatprep.mubr.msk.f32.mxu0 %vm246_vm0, %v6050_v13  ;;  %5501 = vmatpush3.msk.msra.mxu1 %vm253_vm1, %v3375_v2 }
  0xf2   : > { %5271 = vmatprep.subr.msk.mxu1 %vm253_vm1, %v5793_v10  ;;  %v3695_v10 = vsel %vm585_vm3, %v3691_v14, %v3693_v22  ;;  %v4023_v28 = vpop.permute.xlu1 %4022 }
  0xf3   : > { %5258 = vmatmul.mubr.msk.f32.gmra.mxu1 %vm246_vm0, %v6068_v19 }
  0xf4   : > { %5498 = vmatmul.mubr.msk.f32.vlgmr.msra.gmra.mxu0 %vm246_vm0, %v6068_v19  ;;  %5502 = vmatprep.mubr.msk.f32.mxu1 %vm246_vm0, %v5656_v0  ;;  %v3855_v29 = vpop.permute.xlu0 %3854 }
  0xf5   : > { %5265 = vmatpush1.msk.msra.mxu0 %vm253_vm1, %v3376_v23  ;;  %3448 = vmatprep.mubr.f32.mxu0 %v5605_v1 }
  0xf6   : > { %5505 = vmatprep.subr.msk.mxu0 %vm253_vm1, %v5787_v9 }
  0xf7   : > { %5503 = vmatmul.mubr.msk.f32.vlgmr.msra.gmra.mxu1 %vm246_vm0, %v5822_v16 }
  0xf8   : > { %5266 = vmatmul.mubr.msk.f32.vlgmr.msra.gmra.mxu0 %vm246_vm0, %v5656_v0  ;;  %5272 = vmatpush1.msk.msra.mxu1 %vm253_vm1, %v5782_v8  ;;  %v3861_v0 = vsel %vm767_vm4, %v3857_v25, %v3859_v27  ;;  %v3694_v8 = vsel %vm585_vm3, %v3689_v21, %v3691_v14 }
  0xf9   : > { %5506 = vmatpush3.msk.msra.mxu0 %vm253_vm1, %v5787_v9  ;;  %3603 = vmatprep.mubr.f32.mxu1 %v5605_v1  ;;  %v4021_v9 = vpop.permute.xlu1 %4020 }
  0xfa   : > { %3452 = vmatprep.mubr.f32.mxu0 %v5605_v1  ;;  %5278 = vmatprep.subr.msk.mxu0 %vm253_vm1, %v3695_v10  ;;  %v4026_v32 = vsel %vm949_vm5, %v4021_v9, %v4023_v28 }
  0xfb   : > { %5273 = vmatmul.mubr.msk.f32.vlgmr.msra.gmra.mxu1 %vm246_vm0, %v5841_v20  ;;  %5510 = vmatprep.subr.msk.mxu1 %vm253_vm1, %v3693_v22 }
  0xfc   : > { %5267 = vmatmul.mubr.msk.f32.gmra.mxu0 %vm246_vm0, %v5822_v16  ;;  %3607 = vmatprep.mubr.f32.mxu1 %v5605_v1  ;;  %v4025_v16 = vpop.permute.xlu0 %4024 }
  0xfd   : > { %5507 = vmatprep.mubr.msk.f32.mxu0 %vm246_vm0, %v5841_v20  ;;  %5511 = vmatpush3.msk.msra.mxu1 %vm253_vm1, %v3693_v22  ;;  %v3860_v20 = vsel %vm767_vm4, %v3855_v29, %v3857_v25  ;;  %v4027_v31 = vsel %vm949_vm5, %v4023_v28, %v4025_v16 }
  0xfe   : > { %5285 = vmatprep.subr.msk.mxu1 %vm253_vm1, %v3861_v0 }
  0xff   : > { %5274 = vmatmul.mubr.msk.f32.gmra.mxu1 %vm246_vm0, %v5860_v24 }
 0x100   : > { %5508 = vmatmul.mubr.msk.f32.vlgmr.msra.gmra.mxu0 %vm246_vm0, %v5860_v24  ;;  %5512 = vmatprep.mubr.msk.f32.mxu1 %vm246_vm0, %v5867_v26  ;;  %v4189_v24 = vpop.permute.xlu1 %4188 }
 0x101   : > { %5279 = vmatpush1.msk.msra.mxu0 %vm253_vm1, %v3694_v8  ;;  %3766 = vmatprep.mubr.f32.mxu0 %v5605_v1 }
 0x102   : > { %5515 = vmatprep.subr.msk.mxu0 %vm253_vm1, %v3859_v27 }
 0x103   : > { %5513 = vmatmul.mubr.msk.f32.vlgmr.msra.gmra.mxu1 %vm246_vm0, %v5884_v30 }
 0x104   : > { %5280 = vmatmul.mubr.msk.f32.vlgmr.msra.gmra.mxu0 %vm246_vm0, %v5867_v26  ;;  %5286 = vmatpush1.msk.msra.mxu1 %vm253_vm1, %v3860_v20 }
 0x105   : > { %5516 = vmatpush3.msk.msra.mxu0 %vm253_vm1, %v3859_v27  ;;  %3932 = vmatprep.mubr.f32.mxu1 %v5605_v1 }
 0x106   : > { %3770 = vmatprep.mubr.f32.mxu0 %v5605_v1  ;;  %5292 = vmatprep.subr.msk.mxu0 %vm253_vm1, %v4027_v31 }
 0x107   : > { %5287 = vmatmul.mubr.msk.f32.vlgmr.msra.gmra.mxu1 %vm246_vm0, %v5902_v34  ;;  %5520 = vmatprep.subr.msk.mxu1 %vm253_vm1, %v4025_v16 }
 0x108   : > { %5281 = vmatmul.mubr.msk.f32.gmra.mxu0 %vm246_vm0, %v5884_v30  ;;  %3936 = vmatprep.mubr.f32.mxu1 %v5605_v1  ;;  %v4191_v26 = vpop.permute.xlu0 %4190 }
 0x109   : > { %5517 = vmatprep.mubr.msk.f32.mxu0 %vm246_vm0, %v5902_v34  ;;  %5521 = vmatpush3.msk.msra.mxu1 %vm253_vm1, %v4025_v16  ;;  %v4193_v6 = vsel %vm1131_vm6, %v4189_v24, %v4191_v26  ;;  %v4355_v33 = vpop.permute.xlu1 %4354 }
 0x10a   : > { %5299 = vmatprep.subr.msk.mxu1 %vm253_vm1, %v4193_v6 }
 0x10b   : > { %5288 = vmatmul.mubr.msk.f32.gmra.mxu1 %vm246_vm0, %v5919_v38 }
 0x10c   : > { %5518 = vmatmul.mubr.msk.f32.vlgmr.msra.gmra.mxu0 %vm246_vm0, %v5919_v38  ;;  %5522 = vmatprep.mubr.msk.f32.mxu1 %vm246_vm0, %v5927_v40  ;;  %v4187_v30 = vpop.permute.xlu0 %4186 }
 0x10d   : > { %5293 = vmatpush1.msk.msra.mxu0 %vm253_vm1, %v4026_v32  ;;  %4098 = vmatprep.mubr.f32.mxu0 %v5605_v1  ;;  %v4192_v34 = vsel %vm1131_vm6, %v4187_v30, %v4189_v24 }
 0x10e   : > { %5525 = vmatprep.subr.msk.mxu0 %vm253_vm1, %v4191_v26 }
 0x10f   : > { %5523 = vmatmul.mubr.msk.f32.vlgmr.msra.gmra.mxu1 %vm246_vm0, %v5945_v44 }
 0x110   : > { %5294 = vmatmul.mubr.msk.f32.vlgmr.msra.gmra.mxu0 %vm246_vm0, %v5927_v40  ;;  %5300 = vmatpush1.msk.msra.mxu1 %vm253_vm1, %v4192_v34  ;;  %v4353_v38 = vpop.permute.xlu1 %4352 }
 0x111   : > { %5526 = vmatpush3.msk.msra.mxu0 %vm253_vm1, %v4191_v26  ;;  %4264 = vmatprep.mubr.f32.mxu1 %v5605_v1  ;;  %v4357_v7 = vpop.permute.xlu0 %4356  ;;  %v4358_v36 = vsel %vm1313_vm7, %v4353_v38, %v4355_v33 }
 0x112   : > { %4102 = vmatprep.mubr.f32.mxu0 %v5605_v1  ;;  %v4359_v35 = vsel %vm1313_vm7, %v4355_v33, %v4357_v7  ;;  %5530 = vmatprep.subr.msk.mxu1 %vm253_vm1, %v4357_v7  ;;  %vm5034_vm7 = vcmask 1040384  }
 0x113   : > { %5301 = vmatmul.mubr.msk.f32.vlgmr.msra.gmra.mxu1 %vm246_vm0, %v5963_v48  ;;  %5306 = vmatprep.subr.msk.mxu0 %vm253_vm1, %v4359_v35 }
 0x114   : > { %5295 = vmatmul.mubr.msk.f32.gmra.mxu0 %vm246_vm0, %v5945_v44  ;;  %4268 = vmatprep.mubr.f32.mxu1 %v5605_v1 }
 0x115   : > { %v4521_v40 = vpop.permute.xlu1 %4520  ;;  %5527 = vmatprep.mubr.msk.f32.mxu0 %vm246_vm0, %v5963_v48  ;;  %5531 = vmatpush3.msk.msra.mxu1 %vm253_vm1, %v4357_v7 }
 0x116   : > { %v4523_v5 = vpop.permute.xlu0 %4522 }
 0x117   : > { %5302 = vmatmul.mubr.msk.f32.gmra.mxu1 %vm246_vm0, %v5981_v52  ;;  %v4525_v37 = vsel %vm1495_vm8, %v4521_v40, %v4523_v5 }
 0x118   : > { %5528 = vmatmul.mubr.msk.f32.vlgmr.msra.gmra.mxu0 %vm246_vm0, %v5981_v52  ;;  %5532 = vmatprep.mubr.msk.f32.mxu1 %vm246_vm0, %v5996_v56 }
 0x119   : > { %5307 = vmatpush1.msk.msra.mxu0 %vm253_vm1, %v4358_v36  ;;  %v4687_v44 = vpop.permute.xlu1 %4686  ;;  %4430 = vmatprep.mubr.f32.mxu0 %v5605_v1 }
 0x11a   : > { %5535 = vmatprep.subr.msk.mxu0 %vm253_vm1, %v4523_v5  ;;  %v4519_v48 = vpop.permute.xlu0 %4518  ;;  %5313 = vmatprep.subr.msk.mxu1 %vm253_vm1, %v4525_v37 }
 0x11b   : > { %5533 = vmatmul.mubr.msk.f32.vlgmr.msra.gmra.mxu1 %vm246_vm0, %v6004_v57  ;;  %v4524_v39 = vsel %vm1495_vm8, %v4519_v48, %v4521_v40  ;;  %vm5038_vm8 = vcmask 237568  }
 0x11c   : > { %5308 = vmatmul.mubr.msk.f32.vlgmr.msra.gmra.mxu0 %vm246_vm0, %v5996_v56  ;;  %5314 = vmatpush1.msk.msra.mxu1 %vm253_vm1, %v4524_v39 }
 0x11d   : > { %5536 = vmatpush3.msk.msra.mxu0 %vm253_vm1, %v4523_v5  ;;  %4596 = vmatprep.mubr.f32.mxu1 %v5605_v1  ;;  %v4685_v52 = vpop.permute.xlu1 %4684 }
 0x11e   : > { %4434 = vmatprep.mubr.f32.mxu0 %v5605_v1  ;;  %v4690_v56 = vsel %vm1677_vm9, %v4685_v52, %v4687_v44 }
 0x11f   : > { %5315 = vmatmul.mubr.msk.f32.vlgmr.msra.gmra.mxu1 %vm246_vm0, %v6023_v62  ;;  %v4689_v41 = vpop.permute.xlu0 %4688 }
 0x120   : > { %5309 = vmatmul.mubr.msk.f32.gmra.mxu0 %vm246_vm0, %v6004_v57  ;;  %v4691_v42 = vsel %vm1677_vm9, %v4687_v44, %v4689_v41  ;;  %4600 = vmatprep.mubr.f32.mxu1 %v5605_v1 }
 0x121   : > { %5320 = vmatprep.subr.msk.mxu0 %vm253_vm1, %v4691_v42  ;;  %5540 = vmatprep.subr.msk.mxu1 %vm253_vm1, %v4689_v41 }
 0x122   : > { %5537 = vmatprep.mubr.msk.f32.mxu0 %vm246_vm0, %v6023_v62  ;;  %5541 = vmatpush3.msk.msra.mxu1 %vm253_vm1, %v4689_v41 }
 0x123   : > { %5316 = vmatmul.mubr.msk.f32.gmra.mxu1 %vm246_vm0, %v6042_v11 }
 0x124   : > { %5538 = vmatmul.mubr.msk.f32.vlgmr.msra.gmra.mxu0 %vm246_vm0, %v6042_v11  ;;  %5542 = vmatprep.mubr.msk.f32.mxu1 %vm246_vm0, %v6050_v13 }
 0x125   : > { %5321 = vmatpush1.msk.msra.mxu0 %vm253_vm1, %v4690_v56  ;;  %4762 = vmatprep.mubr.f32.mxu0 %v5605_v1 }
 0x127   : > { %5543 = vmatmul.mubr.msk.f32.vlgmr.msra.gmra.mxu1 %vm246_vm0, %v6068_v19 }
 0x128   : > { %5322 = vmatmul.mubr.msk.f32.vlgmr.msra.gmra.mxu0 %vm246_vm0, %v6050_v13 }
 0x129   : > { %4766 = vmatprep.mubr.f32.mxu0 %v5605_v1 }
 0x12c   : > { %5323 = vmatmul.mubr.msk.f32.gmra.mxu0 %vm246_vm0, %v6068_v19 }
 0x14b   : > { %v5414_v57 = vpop.f32.mrf.mxu1 }
 0x14c   : > { %v326_v62 = vpop.f32.mrf.mxu0 }
 0x14d   : > { %v403_v11 = vpop.f32.mrf.mxu1 }
 0x14e   : > { %v328_v43 = vpop.f32.mrf.mxu0 }
 0x14f   : > { %v490_v45 = vpop.f32.mrf.mxu1 }
 0x150   : > { %v491_v46 = vadd.f32 %v490_v45, %v326_v62  ;;  %v332_v47 = vpop.f32.mrf.mxu0 }
 0x151   : > { %v492_v49 = vpop.f32.mrf.mxu1 }
 0x152   : > { %v493_v50 = vadd.f32 %v492_v49, %v328_v43  ;;  %v334_v51 = vpop.f32.mrf.mxu0 }
 0x153   : > { %v496_v53 = vpop.f32.mrf.mxu1 }
 0x154   : > { %v497_v54 = vadd.f32 %v496_v53, %v332_v47  ;;  %v5419_v55 = vpop.f32.mrf.mxu0 }
 0x155   : > { %v573_v58 = vadd.f32 %v5419_v55, %v5414_v57  ;;  %v498_v13 = vpop.f32.mrf.mxu1 }
 0x156   : > { %v499_v59 = vadd.f32 %v498_v13, %v334_v51  ;;  %v567_v1 = vpop.f32.mrf.mxu0 }
 0x157   : > { %v568_v60 = vadd.f32 %v567_v1, %v403_v11  ;;  %v5424_v61 = vpop.f32.mrf.mxu1 }
 0x158   : > { %v757_v19 = vadd.f32 %v5424_v61, %v573_v58  ;;  %v666_v63 = vpop.f32.mrf.mxu0 }
 0x159   : > { %v752_v2 = vadd.f32 %v666_v63, %v491_v46  ;;  %v743_v3 = vpop.f32.mrf.mxu1 }
 0x15a   : > { %v754_v4 = vadd.f32 %v743_v3, %v568_v60  ;;  %v668_v12 = vpop.f32.mrf.mxu0 }
 0x15b   : > { %v753_v14 = vadd.f32 %v668_v12, %v493_v50  ;;  %v848_v15 = vpop.f32.mrf.mxu1 }
 0x15c   : > { %v934_v17 = vadd.f32 %v848_v15, %v752_v2  ;;  %v672_v18 = vpop.f32.mrf.mxu0 }
 0x15d   : > { %v755_v21 = vadd.f32 %v672_v18, %v497_v54  ;;  %v850_v22 = vpop.f32.mrf.mxu1 }
 0x15e   : > { %v935_v23 = vadd.f32 %v850_v22, %v753_v14  ;;  %v674_v25 = vpop.f32.mrf.mxu0 }
 0x15f   : > { %v756_v27 = vadd.f32 %v674_v25, %v499_v59  ;;  %v854_v10 = vpop.f32.mrf.mxu1 }
 0x160   : > { %v937_v28 = vadd.f32 %v854_v10, %v755_v21  ;;  %v5429_v29 = vpop.f32.mrf.mxu0 }
 0x161   : > { %v939_v0 = vadd.f32 %v5429_v29, %v757_v19  ;;  %v856_v8 = vpop.f32.mrf.mxu1 }
 0x162   : > { %v938_v9 = vadd.f32 %v856_v8, %v756_v27  ;;  %v925_v16 = vpop.f32.mrf.mxu0 }
 0x163   : > { %v936_v20 = vadd.f32 %v925_v16, %v754_v4  ;;  %v5434_v31 = vpop.f32.mrf.mxu1 }
 0x164   : > { %v1121_v24 = vadd.f32 %v5434_v31, %v939_v0  ;;  %v1030_v26 = vpop.f32.mrf.mxu0 }
 0x165   : > { %v1116_v6 = vadd.f32 %v1030_v26, %v934_v17  ;;  %v1107_v32 = vpop.f32.mrf.mxu1 }
 0x166   : > { %v1118_v33 = vadd.f32 %v1107_v32, %v936_v20  ;;  %v1032_v30 = vpop.f32.mrf.mxu0 }
 0x167   : > { %v1117_v34 = vadd.f32 %v1032_v30, %v935_v23  ;;  %v1212_v38 = vpop.f32.mrf.mxu1 }
 0x168   : > { %v1298_v7 = vadd.f32 %v1212_v38, %v1116_v6  ;;  %v1036_v35 = vpop.f32.mrf.mxu0 }
 0x169   : > { %v1119_v40 = vadd.f32 %v1036_v35, %v937_v28  ;;  %v1214_v36 = vpop.f32.mrf.mxu1 }
 0x16a   : > { %v6372_v5 = vadd.f32 %v1214_v36, %v1117_v34  ;;  %v1038_v37 = vpop.f32.mrf.mxu0 }
 0x16b   : > { %v1120_v44 = vadd.f32 %v1038_v37, %v938_v9  ;;  %v1218_v48 = vpop.f32.mrf.mxu1 }
 0x16c   : > { %v1301_v39 = vadd.f32 %v1218_v48, %v1119_v40  ;;  %v5439_v52 = vpop.f32.mrf.mxu0 }
 0x16d   : > { %v1303_v41 = vadd.f32 %v5439_v52, %v1121_v24  ;;  %v1220_v42 = vpop.f32.mrf.mxu1 }
 0x16e   : > { %v1302_v56 = vadd.f32 %v1220_v42, %v1120_v44  ;;  %v1289_v57 = vpop.f32.mrf.mxu0 }
 0x16f   : > { %v1300_v62 = vadd.f32 %v1289_v57, %v1118_v33  ;;  %v5444_v11 = vpop.f32.mrf.mxu1 }
 0x170   : > { %v1485_v43 = vadd.f32 %v5444_v11, %v1303_v41  ;;  %v1394_v45 = vpop.f32.mrf.mxu0 }
 0x171   : > { %v1480_v46 = vadd.f32 %v1394_v45, %v1298_v7  ;;  %v1471_v47 = vpop.f32.mrf.mxu1 }
 0x172   : > { %v6374_v49 = vadd.f32 %v1471_v47, %v1300_v62  ;;  %v6376_v50 = vpop.f32.mrf.mxu0 }
 0x173   : > { %v1576_v51 = vpop.f32.mrf.mxu1 }
 0x174   : > { %v6378_v53 = vadd.f32 %v1576_v51, %v1480_v46  ;;  %v1400_v54 = vpop.f32.mrf.mxu0 }
 0x175   : > { %v1483_v55 = vadd.f32 %v1400_v54, %v1301_v39  ;;  %v6380_v58 = vpop.f32.mrf.mxu1 }
 0x176   : > { %v1402_v13 = vpop.f32.mrf.mxu0 }
 0x177   : > { %v1484_v59 = vadd.f32 %v1402_v13, %v1302_v56  ;;  %v1582_v1 = vpop.f32.mrf.mxu1 }
 0x178   : > { %v1665_v60 = vadd.f32 %v1582_v1, %v1483_v55  ;;  %v5449_v61 = vpop.f32.mrf.mxu0 }
 0x179   : > { %v1667_v19 = vadd.f32 %v5449_v61, %v1485_v43  ;;  %v1584_v63 = vpop.f32.mrf.mxu1 }
 0x17a   : > { %v1666_v2 = vadd.f32 %v1584_v63, %v1484_v59  ;;  %v6382_v3 = vpop.f32.mrf.mxu0  ;;  %v6396_v63 = vpop.permute.xlu1 %5003 }
 0x17b   : > { %v5454_v4 = vpop.f32.mrf.mxu1 }
 0x17c   : > { %v6384_v12 = vadd.f32 %v5454_v4, %v1667_v19  ;;  %v6386_v14 = vpop.f32.mrf.mxu0 }
 0x17d   : > { %v6388_v15 = vpop.f32.mrf.mxu1 }
 0x17e   : > { %v6390_v17 = vpop.f32.mrf.mxu0 }
 0x17f   : > { %v1958_v18 = vpop.f32.mrf.mxu1 }
 0x180   : > { %v1764_v21 = vpop.f32.mrf.mxu0 }
 0x181   : > { %v6392_v22 = vadd.f32 %v1764_v21, %v1665_v60  ;;  %v1960_v23 = vpop.f32.mrf.mxu1  ;;  %v1481_v21 = vadd.f32 %v6376_v50, %v6372_v5 }
 0x182   : > { %v1766_v25 = vpop.f32.mrf.mxu0 }
 0x183   : > { %v6394_v27 = vadd.f32 %v1766_v25, %v1666_v2  ;;  %v1964_v10 = vpop.f32.mrf.mxu1 }
 0x184   : > { %v5459_v28 = vpop.f32.mrf.mxu0 }
 0x185   : > { %v1965_v29 = vpop.f32.mrf.mxu1 }
 0x186   : > { %v2033_v0 = vpop.f32.mrf.mxu0 }
 0x187   : > { %v5464_v8 = vpop.f32.mrf.mxu1 }
 0x188   : > { %v2113_v9 = vpop.f32.mrf.mxu0 }
 0x189   : > { %v2188_v16 = vpop.f32.mrf.mxu1  ;;  %v2114_v39 = vadd.f32 %v2113_v9, %v1958_v18 }
 0x18a   : > { %v2115_v20 = vpop.f32.mrf.mxu0  ;;  %v2189_v54 = vadd.f32 %v2188_v16, %v2033_v0  ;;  %v4863_v16 = vlaneseq }
 0x18b   : > { %v2276_v31 = vpop.f32.mrf.mxu1  ;;  %v2116_v42 = vadd.f32 %v2115_v20, %v1960_v23  ;;  %v1663_v20 = vadd.f32 %v6380_v58, %v1481_v21 }
 0x18c   : > { %v2119_v24 = vpop.f32.mrf.mxu0  ;;  %v2359_v62 = vadd.f32 %v2276_v31, %v2114_v39  ;;  %v1844_v31 = vadd.f32 %v6386_v14, %v6378_v53 }
 0x18d   : > { %v2278_v26 = vpop.f32.mrf.mxu1  ;;  %v1845_v5 = vadd.f32 %v6390_v17, %v1663_v20 }
 0x18e   : > { %v2120_v6 = vpop.f32.mrf.mxu0  ;;  %v2360_v45 = vadd.f32 %v2278_v26, %v2116_v42  ;;  %v1853_v26 = vpop.permute.xlu1 %1852 }
 0x18f   : > { %v2282_v32 = vpop.f32.mrf.mxu1  ;;  %v1860_v58 = vadd.f32 %v1853_v26, %v1844_v31 }
 0x190   : > { %v5469_v33 = vpop.f32.mrf.mxu0 }
 0x191   : > { %v2283_v30 = vpop.f32.mrf.mxu1 }
 0x192   : > { %v2351_v34 = vpop.f32.mrf.mxu0  ;;  %v1664_v30 = vadd.f32 %v6382_v3, %v6374_v49  ;;  %v1866_v49 = vmax.f32 %v1860_v58, 0.0  ;;  %v6425_v58 = vpop.permute.xlu0 %1857 }
 0x193   : > { %v5474_v38 = vpop.f32.mrf.mxu1  ;;  %v2361_v1 = vadd.f32 %v2351_v34, %v2189_v54 }
 0x194   : > { %v2442_v7 = vpop.f32.mrf.mxu0  ;;  %v1846_v17 = vadd.f32 %v6388_v15, %v1664_v30 }
 0x195   : > { %v2517_v35 = vpop.f32.mrf.mxu1  ;;  %v2525_v46 = vadd.f32 %v2442_v7, %v2359_v62 }
 0x196   : > { %v2444_v40 = vpop.f32.mrf.mxu0  ;;  %v2527_v25 = vadd.f32 %v2517_v35, %v2361_v1  ;;  %v6406_v35 = vshrl.u32 %v4863_v16, 7  ;;  %v1862_v15 = vadd.f32 %v1853_v26, %v1846_v17 }
 0x197   : > { %v2608_v36 = vpop.f32.mrf.mxu1  ;;  %v2526_v55 = vadd.f32 %v2444_v40, %v2360_v45 }
 0x198   : > { %v2448_v37 = vpop.f32.mrf.mxu0  ;;  %v2691_v60 = vadd.f32 %v2608_v36, %v2525_v46  ;;  %vm5053_vm9 = vcmp.eq.s32.totalorder %v6406_v35, 0 }
 0x199   : > { %v2610_v44 = vpop.f32.mrf.mxu1  ;;  %v1861_v37 = vadd.f32 %v1853_v26, %v1845_v5 }
 0x19a   : > { %v2449_v48 = vpop.f32.mrf.mxu0  ;;  %v2692_v2 = vadd.f32 %v2610_v44, %v2526_v55 }
 0x19b   : > { %v2614_v52 = vpop.f32.mrf.mxu1  ;;  %v1867_v45 = vmax.f32 %v1861_v37, 0.0 }
 0x19c   : > { %v5479_v41 = vpop.f32.mrf.mxu0 }
 0x19d   : > { %v2615_v56 = vpop.f32.mrf.mxu1  ;;  %v4865_v41 = vsub.s32 0, %v6406_v35 }
 0x19e   : > { %v2683_v57 = vpop.f32.mrf.mxu0 }
 0x19f   : > { %v5484_v11 = vpop.f32.mrf.mxu1  ;;  %v2693_v0 = vadd.f32 %v2683_v57, %v2527_v25  ;;  %v4869_v57 = vsub.s32 1, %v6406_v35 }
 0x1a0   : > { %v2774_v43 = vpop.f32.mrf.mxu0 }
 0x1a1   : > { %v2849_v47 = vpop.f32.mrf.mxu1  ;;  %v2857_v4 = vadd.f32 %v2774_v43, %v2691_v60  ;;  %v226_v43 = vld [vmem:[%s6487_s4] sm:$0x7] }
 0x1a2   : > { %v2776_v51 = vpop.f32.mrf.mxu0  ;;  %v2859_v34 = vadd.f32 %v2849_v47, %v2693_v0  ;;  %v6414_v60 = vrot.slane %v226_v43, %v4865_v41 }
 0x1a3   : > { %v2940_v13 = vpop.f32.mrf.mxu1  ;;  %v2858_v10 = vadd.f32 %v2776_v51, %v2692_v2 }
 0x1a4   : > { %v2780_v59 = vpop.f32.mrf.mxu0  ;;  %v3023_v8 = vadd.f32 %v2940_v13, %v2857_v4  ;;  %v4873_v4 = vsub.s32 2, %v6406_v35 }
 0x1a5   : > { %v2942_v61 = vpop.f32.mrf.mxu1 }
 0x1a6   : > { %v2781_v19 = vpop.f32.mrf.mxu0  ;;  %v3024_v6 = vadd.f32 %v2942_v61, %v2858_v10  ;;  %v6416_v61 = vrot.slane %v226_v43, %v4869_v57  ;;  %v6421_v16 = vrot.slane %v226_v43, %v4873_v4  ;;  %v1863_v57 = vadd.f32 %v6425_v58, %v6392_v22 }
 0x1a7   : > { %v2946_v18 = vpop.f32.mrf.mxu1 }
 0x1a8   : > { %v5489_v23 = vpop.f32.mrf.mxu0 }
 0x1a9   : > { %v2947_v28 = vpop.f32.mrf.mxu1  ;;  %v1868_v23 = vmax.f32 %v1862_v15, 0.0 }
 0x1aa   : > { %v3015_v29 = vpop.f32.mrf.mxu0 }
 0x1ab   : > { %v5494_v9 = vpop.f32.mrf.mxu1  ;;  %v3025_v53 = vadd.f32 %v3015_v29, %v2859_v34 }
 0x1ac   : > { %v3106_v24 = vpop.f32.mrf.mxu0 }
 0x1ad   : > { %v3189_v32 = vadd.f32 %v3106_v24, %v3023_v8  ;;  %v3181_v33 = vpop.f32.mrf.mxu1 }
 0x1ae   : > { %v3108_v50 = vpop.f32.mrf.mxu0  ;;  %v3191_v62 = vadd.f32 %v3181_v33, %v3025_v53 }
 0x1af   : > { %v3190_v38 = vadd.f32 %v3108_v50, %v3024_v6  ;;  %v3272_v7 = vpop.f32.mrf.mxu1 }
 0x1b0   : > { %v3355_v40 = vadd.f32 %v3272_v7, %v3189_v32  ;;  %v3112_v36 = vpop.f32.mrf.mxu0 }
 0x1b1   : > { %v3274_v14 = vpop.f32.mrf.mxu1 }
 0x1b2   : > { %v3358_v44 = vadd.f32 %v3355_v40, %v1853_v26  ;;  %v3356_v48 = vadd.f32 %v3274_v14, %v3190_v38  ;;  %v3113_v39 = vpop.f32.mrf.mxu0  ;;  %v1865_v14 = vadd.f32 %v6425_v58, %v6384_v12 }
 0x1b3   : > { %v3278_v52 = vpop.f32.mrf.mxu1 }
 0x1b4   : > { %v3361_v3 = vmax.f32 %v3358_v44, 0.0  ;;  %v3359_v42 = vadd.f32 %v3356_v48, %v1853_v26  ;;  %v5499_v56 = vpop.f32.mrf.mxu0  ;;  %v6429_v17 = vmax.f32 %v1865_v14, 0.0 }
 0x1b5   : > { %v3279_v11 = vpop.f32.mrf.mxu1 }
 0x1b6   : > { %v4856_v46 = vsub.f32 %v1866_v49, %v3361_v3  ;;  %v3362_v47 = vmax.f32 %v3359_v42, 0.0  ;;  %v3347_v51 = vpop.f32.mrf.mxu0  ;;  %v4896_v42 = vmul.f32 %v6429_v17, %v6429_v17 }
 0x1b7   : > { %v3357_v54 = vadd.f32 %v3347_v51, %v3191_v62  ;;  %v5504_v55 = vpop.f32.mrf.mxu1  ;;  %v6438_v51 = vmax.f32 %v1863_v57, 0.0 }
 0x1b8   : > { %v4859_v13 = vmul.f32 %v4856_v46, %v4856_v46  ;;  %v4857_v59 = vsub.f32 %v1867_v45, %v3362_v47  ;;  %v3450_v1 = vpop.f32.mrf.mxu0  ;;  %v1864_v45 = vadd.f32 %v6425_v58, %v6394_v27  ;;  %v4909_v46 = vsel %vm4882_vm10, %v4896_v42, 0.0 }
 0x1b9   : > { %v3360_v19 = vadd.f32 %v3357_v54, %v1853_v26  ;;  %v3525_v2 = vpop.f32.mrf.mxu1  ;;  %v4894_v4 = vmul.f32 %v6438_v51, %v6438_v51 }
 0x1ba   : > { %v4860_v18 = vmul.f32 %v4857_v59, %v4857_v59  ;;  %v3451_v21 = vpop.f32.mrf.mxu0  ;;  %v4878_v29 = vmul.f32 %v6414_v60, %v4859_v13  ;;  %v4910_v59 = vrot.slane %v4909_v46, 4 }
 0x1bb   : > { %v3363_v25 = vmax.f32 %v3360_v19, 0.0  ;;  %v3605_v10 = vpop.f32.mrf.mxu1  ;;  %v6440_v19 = vmax.f32 %v1864_v45, 0.0 }
 0x1bc   : > { %v3454_v28 = vpop.f32.mrf.mxu0  ;;  %v4879_v0 = vmul.f32 %v6416_v61, %v4860_v18 }
 0x1bd   : > { %v4858_v8 = vsub.f32 %v1868_v23, %v3363_v25  ;;  %v3606_v9 = vpop.f32.mrf.mxu1  ;;  %v4911_v25 = vadd.f32 %v4910_v59, %v4909_v46 }
 0x1be   : > { %v3456_v20 = vpop.f32.mrf.mxu0  ;;  %v4881_v31 = vadd.f32 %v4879_v0, %v4878_v29  ;;  %v4895_v29 = vmul.f32 %v6440_v19, %v6440_v19 }
 0x1bf   : > { %v4861_v24 = vmul.f32 %v4858_v8, %v4858_v8  ;;  %v3609_v26 = vpop.f32.mrf.mxu1 }
 0x1c0   : > { %v5509_v6 = vpop.f32.mrf.mxu0  ;;  %v3610_v22 = vadd.f32 %v3609_v26, %v3454_v28 }
 0x1c1   : > { %v3611_v32 = vpop.f32.mrf.mxu1  ;;  %v4880_v33 = vmul.f32 %v6421_v16, %v4861_v24  ;;  %v3685_v11 = vadd.f32 %v5509_v6, %v5504_v55 }
 0x1c2   : > { %v3680_v5 = vpop.f32.mrf.mxu0  ;;  %v3612_v27 = vadd.f32 %v3611_v32, %v3456_v20 }
 0x1c3   : > { %v5514_v50 = vpop.f32.mrf.mxu1  ;;  %v4883_v30 = vsel %vm4882_vm10, %v4880_v33, 0.0  ;;  %v4912_v33 = vrot.slane %v4911_v25, 2 }
 0x1c4   : > { %v3768_v34 = vpop.f32.mrf.mxu0  ;;  %v4884_v38 = vadd.f32 %v4883_v30, %v4881_v31  ;;  %v3853_v54 = vadd.f32 %v5514_v50, %v3685_v11  ;;  %v4897_v31 = vrot.slane %v4894_v4, 4  ;;  %v4903_v50 = vrot.slane %v4895_v29, 4 }
 0x1c5   : > { %v3843_v7 = vpop.f32.mrf.mxu1 }
 0x1c6   : > { %4885 = vadd.xlane.f32.xlu0 %v4884_v38  ;;  %v3769_v40 = vpop.f32.mrf.mxu0  ;;  %v4898_v34 = vadd.f32 %v4897_v31, %v4894_v4 }
 0x1c7   : > { %v3934_v36 = vpop.f32.mrf.mxu1 }
 0x1c8   : > { %v3772_v53 = vpop.f32.mrf.mxu0 }
 0x1c9   : > { %v3935_v37 = vpop.f32.mrf.mxu1  ;;  %v3851_v21 = vadd.f32 %v3772_v53, %v3610_v22  ;;  %v4913_v53 = vadd.f32 %v4912_v33, %v4911_v25 }
 0x1ca   : > { %v3774_v44 = vpop.f32.mrf.mxu0  ;;  %v4904_v37 = vadd.f32 %v4903_v50, %v4895_v29 }
 0x1cb   : > { %v3938_v48 = vpop.f32.mrf.mxu1  ;;  %v3852_v0 = vadd.f32 %v3774_v44, %v3612_v27  ;;  %v4914_v57 = vrot.slane %v4913_v53, 1 }
 0x1cc   : > { %v5519_v39 = vpop.f32.mrf.mxu0  ;;  %v4017_v28 = vadd.f32 %v3938_v48, %v3851_v21  ;;  %v4899_v48 = vrot.slane %v4898_v34, 2  ;;  %v4905_v11 = vrot.slane %v4904_v37, 2 }
 0x1cd   : > { %v3940_v52 = vpop.f32.mrf.mxu1  ;;  %v4019_v2 = vadd.f32 %v5519_v39, %v3853_v54  ;;  %v4915_v54 = vadd.f32 %v4914_v57, %v4913_v53 }
 0x1ce   : > { %v4009_v41 = vpop.f32.mrf.mxu0  ;;  %v4018_v30 = vadd.f32 %v3940_v52, %v3852_v0  ;;  %v4900_v45 = vadd.f32 %v4899_v48, %v4898_v34 }
 0x1cf   : > { %v5524_v49 = vpop.f32.mrf.mxu1  ;;  %5573 = vrsqrt.f32 %v4915_v54  ;;  %vm4932_vm11 = vcmp.eq.f32.partialorder %v4915_v54, inf  ;;  %vm4934_vm12 = vcmp.eq.f32.partialorder %v4915_v54, 0.0 }
 0x1d0   : > { %v4100_v3 = vpop.f32.mrf.mxu0  ;;  %v4185_v8 = vadd.f32 %v5524_v49, %v4019_v2 }
 0x1d1   : > { %v4175_v56 = vpop.f32.mrf.mxu1 }
 0x1d2   : > { %v4101_v62 = vpop.f32.mrf.mxu0 }
 0x1d3   : > { %v4266_v12 = vpop.f32.mrf.mxu1 }
 0x1d4   : > { %v4104_v43 = vpop.f32.mrf.mxu0 }
 0x1d5   : > { %v4267_v47 = vpop.f32.mrf.mxu1  ;;  %v4183_v20 = vadd.f32 %v4104_v43, %v4017_v28 }
 0x1d6   : > { %v4106_v15 = vpop.f32.mrf.mxu0 }
 0x1d7   : > { %v4270_v13 = vpop.f32.mrf.mxu1  ;;  %v4184_v7 = vadd.f32 %v4106_v15, %v4018_v30 }
 0x1d8   : > { %v5529_v1 = vpop.f32.mrf.mxu0  ;;  %v4349_v44 = vadd.f32 %v4270_v13, %v4183_v20 }
 0x1d9   : > { %v4272_v55 = vpop.f32.mrf.mxu1  ;;  %v4351_v26 = vadd.f32 %v5529_v1, %v4185_v8  ;;  %v4906_v1 = vadd.f32 %v4905_v11, %v4904_v37 }
 0x1da   : > { %v4341_v18 = vpop.f32.mrf.mxu0  ;;  %v4350_v3 = vadd.f32 %v4272_v55, %v4184_v7  ;;  %v4901_v55 = vrot.slane %v4900_v45, 1 }
 0x1db   : > { %v5534_v23 = vpop.f32.mrf.mxu1  ;;  %v4907_v25 = vrot.slane %v4906_v1, 1 }
 0x1dc   : > { %v4432_v10 = vpop.f32.mrf.mxu0  ;;  %v4517_v40 = vadd.f32 %v5534_v23, %v4351_v26  ;;  %v4902_v8 = vadd.f32 %v4901_v55, %v4900_v45 }
 0x1dd   : > { %v4507_v9 = vpop.f32.mrf.mxu1  ;;  %v4908_v28 = vadd.f32 %v4907_v25, %v4906_v1 }
 0x1de   : > { %v4433_v24 = vpop.f32.mrf.mxu0  ;;  %5575 = vrsqrt.f32 %v4902_v8  ;;  %vm4918_vm13 = vcmp.eq.f32.partialorder %v4902_v8, inf  ;;  %v4921_v11 = vand.u32 2147483648, %v4902_v8  ;;  %vm4920_vm14 = vcmp.eq.f32.partialorder %v4902_v8, 0.0 }
 0x1df   : > { %v4598_v6 = vpop.f32.mrf.mxu1  ;;  %5577 = vrsqrt.f32 %v4908_v28  ;;  %vm4925_vm15 = vcmp.eq.f32.partialorder %v4908_v28, inf  ;;  %vm4927_vm2 = vcmp.eq.f32.partialorder %v4908_v28, 0.0 }
 0x1e0   : > { %v4436_v5 = vpop.f32.mrf.mxu0 }
 0x1e1   : > { %v4599_v32 = vpop.f32.mrf.mxu1  ;;  %v4515_v42 = vadd.f32 %v4436_v5, %v4349_v44 }
 0x1e2   : > { %v4438_v38 = vpop.f32.mrf.mxu0 }
 0x1e3   : > { %v4602_v36 = vpop.f32.mrf.mxu1  ;;  %v4516_v12 = vadd.f32 %v4438_v38, %v4350_v3 }
 0x1e4   : > { %v5539_v14 = vpop.f32.mrf.mxu0  ;;  %v4681_v15 = vadd.f32 %v4602_v36, %v4515_v42  ;;  %v4935_v42 = vand.u32 2147483648, %v4915_v54 }
 0x1e5   : > { %v4683_v39 = vadd.f32 %v5539_v14, %v4517_v40  ;;  %v4604_v41 = vpop.f32.mrf.mxu1  ;;  %v5574_v40 = vpop.eup %5573 }
 0x1e6   : > { %v4673_v49 = vpop.f32.mrf.mxu0  ;;  %v4682_v22 = vadd.f32 %v4604_v41, %v4516_v12  ;;  %v4931_v44 = vmul.f32 %v5574_v40, %v4915_v54 }
 0x1e7   : > { %v5544_v56 = vpop.f32.mrf.mxu1 }
 0x1e8   : > { %v4849_v52 = vadd.f32 %v5544_v56, %v4683_v39  ;;  %v4764_v62 = vpop.f32.mrf.mxu0  ;;  %v4933_v48 = vsel %vm4932_vm11, %v4915_v54, %v4931_v44 }
 0x1e9   : > { %v4839_v43 = vpop.f32.mrf.mxu1  ;;  %v4936_v56 = vsel %vm4934_vm12, %v4935_v42, %v4933_v48 }
 0x1ea   : > { %v4852_v46 = vadd.f32 %v4849_v52, %v6425_v58  ;;  %v4765_v47 = vpop.f32.mrf.mxu0  ;;  %v4939_v12 = vadd.f32 1e-10, %v4936_v56 }
 0x1eb   : > { %v5576_v39 = vpop.eup %5575 }
 0x1ec   : > { %v6447_v13 = vmax.f32 %v4852_v46, 0.0  ;;  %v4768_v59 = vpop.f32.mrf.mxu0  ;;  %v5578_v49 = vpop.eup %5577  ;;  %v4917_v3 = vmul.f32 %v5576_v39, %v4902_v8 }
 0x1ed   : > { %v4847_v2 = vadd.f32 %v4768_v59, %v4681_v15  ;;  %v4924_v57 = vmul.f32 %v5578_v49, %v4908_v28  ;;  %v4928_v59 = vand.u32 2147483648, %v4908_v28 }
 0x1ee   : > { %v4945_v4 = vmul.f32 %v6447_v13, %v6447_v13  ;;  %v4770_v18 = vpop.f32.mrf.mxu0  ;;  %v4919_v62 = vsel %vm4918_vm13, %v4902_v8, %v4917_v3 }
 0x1ef   : > { %v4850_v27 = vadd.f32 %v4847_v2, %v6425_v58  ;;  %v4848_v21 = vadd.f32 %v4770_v18, %v4682_v22  ;;  %v4922_v46 = vsel %vm4920_vm14, %v4921_v11, %v4919_v62  ;;  %v4926_v47 = vsel %vm4925_vm15, %v4908_v28, %v4924_v57 }
 0x1f0   : > { %v4958_v23 = vsel %vm4882_vm10, %v4945_v4, 0.0  ;;  %v4937_v2 = vadd.f32 1e-10, %v4922_v46  ;;  %v4929_v55 = vsel %vm4927_vm2, %v4928_v59, %v4926_v47 }
 0x1f1   : > { %v4959_v10 = vrot.slane %v4958_v23, 4  ;;  %v6453_v29 = vmax.f32 %v4850_v27, 0.0  ;;  %v4851_v0 = vadd.f32 %v4848_v21, %v6425_v58 }
 0x1f3   : > { %v4960_v9 = vadd.f32 %v4959_v10, %v4958_v23  ;;  %v4943_v31 = vmul.f32 %v6453_v29, %v6453_v29  ;;  %v6458_v24 = vmax.f32 %v4851_v0, 0.0  ;;  %v4938_v23 = vadd.f32 1e-10, %v4929_v55 }
 0x1f5   : > { %v4961_v26 = vrot.slane %v4960_v9, 2  ;;  %v4946_v6 = vrot.slane %v4943_v31, 4  ;;  %v4944_v33 = vmul.f32 %v6458_v24, %v6458_v24 }
 0x1f7   : > { %v4962_v5 = vadd.f32 %v4961_v26, %v4960_v9  ;;  %v4947_v50 = vadd.f32 %v4946_v6, %v4943_v31  ;;  %v4952_v30 = vrot.slane %v4944_v33, 4 }
 0x1f9   : > { %v4963_v20 = vrot.slane %v4962_v5, 1  ;;  %v4948_v58 = vrot.slane %v4947_v50, 2  ;;  %v4953_v32 = vadd.f32 %v4952_v30, %v4944_v33 }
 0x1fb   : > { %v4964_v34 = vadd.f32 %v4963_v20, %v4962_v5  ;;  %v4949_v38 = vadd.f32 %v4948_v58, %v4947_v50  ;;  %v4954_v7 = vrot.slane %v4953_v32, 2 }
 0x1fd   : > { %5579 = vrsqrt.f32 %v4964_v34  ;;  %v4950_v36 = vrot.slane %v4949_v38, 1  ;;  %v4955_v53 = vadd.f32 %v4954_v7, %v4953_v32  ;;  %vm4981_vm0 = vcmp.eq.f32.partialorder %v4964_v34, inf }
 0x1fe   : > { %v4984_v45 = vand.u32 2147483648, %v4964_v34  ;;  %vm4983_vm1 = vcmp.eq.f32.partialorder %v4964_v34, 0.0 }
 0x1ff   : > { %v4951_v14 = vadd.f32 %v4950_v36, %v4949_v38  ;;  %v4956_v37 = vrot.slane %v4955_v53, 1 }
 0x201   : > { %5581 = vrsqrt.f32 %v4951_v14  ;;  %v4957_v41 = vadd.f32 %v4956_v37, %v4955_v53  ;;  %vm4967_vm3 = vcmp.eq.f32.partialorder %v4951_v14, inf  ;;  %v4970_v18 = vand.u32 2147483648, %v4951_v14 }
 0x202   : > { %vm4969_vm4 = vcmp.eq.f32.partialorder %v4951_v14, 0.0 }
 0x203   : > { %5583 = vrsqrt.f32 %v4957_v41  ;;  %vm4974_vm5 = vcmp.eq.f32.partialorder %v4957_v41, inf  ;;  %v4977_v8 = vand.u32 2147483648, %v4957_v41  ;;  %vm4976_vm6 = vcmp.eq.f32.partialorder %v4957_v41, 0.0 }
 0x204   : > { %5585 = vrcp.f32 %v4939_v12 }
 0x20a   : > { %v5580_v52 = vpop.eup %5579 }
 0x20b   : > { %v4980_v43 = vmul.f32 %v5580_v52, %v4964_v34 }
 0x20d   : > { %v4982_v15 = vsel %vm4981_vm0, %v4964_v34, %v4980_v43 }
 0x20e   : > { %v4985_v1 = vsel %vm4983_vm1, %v4984_v45, %v4982_v15  ;;  %v5582_v22 = vpop.eup %5581 }
 0x20f   : > { %v4988_v54 = vadd.f32 1e-10, %v4985_v1  ;;  %v4966_v4 = vmul.f32 %v5582_v22, %v4951_v14 }
 0x210   : > { %v5584_v27 = vpop.eup %5583 }
 0x211   : > { %5587 = vrcp.f32 %v4988_v54  ;;  %v4968_v21 = vsel %vm4967_vm3, %v4951_v14, %v4966_v4  ;;  %v4973_v10 = vmul.f32 %v5584_v27, %v4957_v41  ;;  %v5586_v26 = vpop.eup %5585 }
 0x212   : > { %v4971_v25 = vsel %vm4969_vm4, %v4970_v18, %v4968_v21  ;;  %5589 = vrcp.f32 %v4937_v2  ;;  %v4994_v33 = vmul.f32 %v5586_v26, %v6429_v17 }
 0x213   : > { %v4986_v0 = vadd.f32 1e-10, %v4971_v25  ;;  %v4975_v9 = vsel %vm4974_vm5, %v4957_v41, %v4973_v10 }
 0x214   : > { %v4978_v31 = vsel %vm4976_vm6, %v4977_v8, %v4975_v9 }
 0x215   : > { %5591 = vrcp.f32 %v4986_v0  ;;  %v4987_v28 = vadd.f32 1e-10, %v4978_v31 }
 0x216   : > { %5593 = vrcp.f32 %v4938_v23 }
 0x217   : > { %5595 = vrcp.f32 %v4987_v28 }
 0x21e   : > { %v5588_v6 = vpop.eup %5587 }
 0x21f   : > { %v4997_v5 = vmul.f32 %v5588_v6, %v6447_v13  ;;  %v5590_v50 = vpop.eup %5589 }
 0x220   : > { %v4992_v34 = vmul.f32 %v5590_v50, %v6438_v51 }
 0x221   : > { %v5000_v30 = vsub.f32 %v4994_v33, %v4997_v5 }
 0x222   : > { %v5592_v20 = vpop.eup %5591 }
 0x223   : > { %v5008_v58 = vmul.f32 %v6396_v63, %v5000_v30  ;;  %v5594_v32 = vpop.eup %5593  ;;  %v4995_v38 = vmul.f32 %v5592_v20, %v6453_v29 }
 0x224   : > { %v5596_v40 = vpop.eup %5595  ;;  %v4993_v53 = vmul.f32 %v5594_v32, %v6440_v19 }
 0x225   : > { %v5011_v7 = vmul.f32 %v5008_v58, %v5000_v30  ;;  %v4998_v36 = vsub.f32 %v4992_v34, %v4995_v38  ;;  %v4996_v17 = vmul.f32 %v5596_v40, %v6458_v24 }
 0x227   : > { %v5024_v14 = vsel %vm4882_vm10, %v5011_v7, 0.0  ;;  %v5006_v37 = vmul.f32 %v6396_v63, %v4998_v36  ;;  %v4999_v44 = vsub.f32 %v4993_v53, %v4996_v17 }
 0x228   : > { %v5025_v13 = vrot.slane %v5024_v14, 4 }
 0x229   : > { %v5009_v39 = vmul.f32 %v5006_v37, %v4998_v36  ;;  %v5007_v48 = vmul.f32 %v6396_v63, %v4999_v44 }
 0x22a   : > { %v5026_v41 = vadd.f32 %v5025_v13, %v5024_v14 }
 0x22b   : > { %v5012_v51 = vrot.slane %v5009_v39, 4  ;;  %v5010_v29 = vmul.f32 %v5007_v48, %v4999_v44 }
 0x22c   : > { %v5027_v49 = vrot.slane %v5026_v41, 2 }
 0x22d   : > { %v5013_v3 = vadd.f32 %v5012_v51, %v5009_v39  ;;  %v5018_v42 = vrot.slane %v5010_v29, 4 }
 0x22e   : > { %v5028_v56 = vadd.f32 %v5027_v49, %v5026_v41 }
 0x22f   : > { %v5014_v57 = vrot.slane %v5013_v3, 2  ;;  %v5019_v19 = vadd.f32 %v5018_v42, %v5010_v29 }
 0x230   : > { %v5029_v11 = vrot.slane %v5028_v56, 1 }
 0x231   : > { %v5015_v52 = vadd.f32 %v5014_v57, %v5013_v3  ;;  %v5020_v62 = vrot.slane %v5019_v19, 2 }
 0x232   : > { %v5030_v46 = vadd.f32 %v5029_v11, %v5028_v56 }
 0x233   : > { %v5016_v24 = vrot.slane %v5015_v52, 1  ;;  %v5021_v12 = vadd.f32 %v5020_v62, %v5019_v19 }
 0x234   : > { %v5033_v59 = vmul.f32 %v5030_v46, %v6421_v16 }
 0x235   : > { %v5017_v43 = vadd.f32 %v5016_v24, %v5015_v52  ;;  %v5022_v45 = vrot.slane %v5021_v12, 1 }
 0x236   : > { %v5039_v2 = vsel %vm5038_vm8, %v5033_v59, 0.0 }
 0x237   : > { %v5023_v47 = vadd.f32 %v5022_v45, %v5021_v12  ;;  %v5031_v15 = vmul.f32 %v5017_v43, %v6414_v60 }
 0x239   : > { %v5032_v63 = vmul.f32 %v5023_v47, %v6416_v61  ;;  %v5035_v1 = vsel %vm5034_vm7, %v5031_v15, 0.0 }
 0x23b   : > { %v5036_v22 = vsel %vm5034_vm7, %v5032_v63, 0.0 }
 0x23c   : > { %v5037_v54 = vadd.f32 %v5036_v22, %v5035_v1 }
 0x23e   : > { %v5040_v55 = vadd.f32 %v5039_v2, %v5037_v54 }
 0x240   : > { %5041 = vadd.xlane.f32.xlu1 %v5040_v55 }
 0x24f   : > { %v4886_v4 = vpop.xlane.xlu0 %4885 }
 0x250   : > { %v4887_v18 = vrot.slane %v4886_v4, 4 }
 0x252   : > { %v4888_v27 = vadd.f32 %v4887_v18, %v4886_v4 }
 0x254   : > { %v4889_v21 = vrot.slane %v4888_v27, 2 }
 0x256   : > { %v4890_v23 = vadd.f32 %v4889_v21, %v4888_v27 }
 0x258   : > { %v4891_v25 = vrot.slane %v4890_v23, 1 }
 0x25a   : > { %v4892_v60 = vadd.f32 %v4891_v25, %v4890_v23 }
 0x25c   : > { %5546 = vpush %v4892_v60 }
 0x28d   : > { %s5547_s30 = spop %5546 }
 0x28e   : > { %v5054_v28 = vstv %s5547_s30 }
 0x2c9   : > { %v5042_v10 = vpop.xlane.xlu1 %5041 }
 0x2ca   : > { %v5043_v61 = vrot.slane %v5042_v10, 4 }
 0x2cc   : > { %v5044_v0 = vadd.f32 %v5043_v61, %v5042_v10 }
 0x2ce   : > { %v5045_v16 = vrot.slane %v5044_v0, 2 }
 0x2d0   : > { %v5046_v8 = vadd.f32 %v5045_v16, %v5044_v0 }
 0x2d2   : > { %v5047_v9 = vrot.slane %v5046_v8, 1 }
 0x2d4   : > { %v5048_v31 = vadd.f32 %v5047_v9, %v5046_v8 }
 0x2d6   : > { %5548 = vpush %v5048_v31 }
 0x307   : > { %s5549_s9 = spop %5548 }
 0x308   : > { %s5050_s7 = smul.f32 0.00390625, %s5549_s9 }
 0x30a   : > { %v5055_v26 = vstv %s5050_s7 }
 0x30b   : > { %v5056_v6 = vsel %vm5053_vm9, %v5054_v28, %v5055_v26 }
 0x30c   : > { %5057 = vst [vmem:[%s222_s12] sm:$0xff] %v5056_v6 }
 0x30d PF: > { %s15_s18 = sadd.s32 1, %s5603_s18  }
 0x30e   : > { %p12_p4 = scmp.ge.s32.totalorder %s15_s18, 4  }
 0x310   :  { %14 = sbr.rel (!%p12_p4) target bundleno = 1 (0x1), region = 80 }

</bundles_post_ra>
